<compile_context>
chip_gen: v6e
topology: v6e:2x2x1
jax: 0.10.0
libtpu: 0.0.40
codegen_flags: <defaults>
</compile_context>

<pallas_src>
from functools import partial

import jax
import jax.numpy as jnp
from jax import lax
from jax.experimental import pallas as pl
from jax.experimental.pallas import tpu as pltpu


def _self_attn_kernel(x_ref, wk_ref, bk_ref, wv_ref, bv_ref, ww_ref, o_ref,
                      k_vmem, v_vmem, *, q_tile, key_channels):
    qi = pl.program_id(1)
    scale = key_channels ** -0.5

    # --- once per batch: full-HW K/V projection cached in bf16 VMEM scratch ---
    @pl.when(qi == 0)
    def _():
        x_bf = x_ref[...].astype(jnp.bfloat16)                               # [HW, Cin]
        k = jnp.dot(x_bf, wk_ref[...], preferred_element_type=jnp.float32) \
            + bk_ref[...]                                                    # [HW, Ck]
        k_vmem[...] = jnp.maximum(k, 0.0).astype(jnp.bfloat16)               # conv+BN(folded)+ReLU
        v = jnp.dot(x_bf, wv_ref[...], preferred_element_type=jnp.float32) \
            + bv_ref[...]                                                    # [HW, Cv]
        v_vmem[...] = v.astype(jnp.bfloat16)                                 # conv+bias only

    # --- per query tile: Q is the K rows of this tile (f_query == f_key) ---
    start = pl.multiple_of(qi * q_tile, q_tile)
    q_rows = k_vmem[pl.ds(start, q_tile), :]                                 # [TQ, Ck] bf16
    q = (q_rows.astype(jnp.float32) * scale).astype(jnp.bfloat16)

    # sim = softmax(Q @ K^T): contract the channel dims directly (no transpose).
    sim = lax.dot_general(q, k_vmem[...], (((1,), (1,)), ((), ())),
                          preferred_element_type=jnp.float32)                # [TQ, HW]
    sim = sim - jnp.max(sim, axis=-1, keepdims=True)
    p = jnp.exp(sim)
    p = p * pl.reciprocal(jnp.sum(p, axis=-1, keepdims=True), approx=True)

    # context = sim_map @ V  (bf16 MXU feed, f32 accumulation).
    ctx = jnp.dot(p.astype(jnp.bfloat16), v_vmem[...],
                  preferred_element_type=jnp.float32)                        # [TQ, Cv]

    # Final 1x1 conv W, emitted directly as [Cout, TQ] (lane-dense output tile).
    # Bias of W is added wrapper-side.
    out_t = lax.dot_general(ww_ref[...], ctx.astype(jnp.bfloat16),
                            (((0,), (1,)), ((), ())),
                            preferred_element_type=jnp.float32)              # [Cout, TQ]
    o_ref[...] = out_t.astype(o_ref.dtype)


def self_attention_block(x_nchw, wk, bk, wv, bv, ww, bw, *, q_tile=256):
    """Pallas forward.  x_nchw: [N, Cin, H, W] float32 -> [N, Cout, H, W]."""
    N, Cin, H, W = x_nchw.shape
    HW = H * W
    Ck = wk.shape[1]
    Cv = wv.shape[1]
    Cout = ww.shape[1]

    # Query-tile size: TQ must divide HW and keep lane-dense (multiple-of-128) output
    # stores; fall back to the full extent otherwise.
    # TODO(synk): flash-style kv axis + key masking for ragged / very large HW.
    TQ = q_tile if (HW >= q_tile and HW % q_tile == 0) else HW
    num_q = HW // TQ

    # NCHW -> [N, HW, Cin]  (channels on lanes for the projection matmuls).
    x = jnp.transpose(x_nchw, (0, 2, 3, 1)).reshape(N, HW, Cin)

    # Pre-cast weights once to bf16 (MXU feeds); biases stay f32 (added to f32 acc).
    wk_bf = wk.astype(jnp.bfloat16)
    wv_bf = wv.astype(jnp.bfloat16)
    ww_bf = ww.astype(jnp.bfloat16)

    # Generation-aware VMEM budget: ~3/4 of physical capacity, capped at 96 MiB
    # (=> ~96 MiB on v5e/v6e, ~48 MiB on v7x).
    try:
        vmem_cap = pltpu.get_tpu_info().vmem_capacity_bytes
        vmem_limit = int(min(96 * 1024 * 1024, (vmem_cap * 3) // 4))
    except Exception:
        vmem_limit = 32 * 1024 * 1024

    out_chw = pl.pallas_call(
        partial(_self_attn_kernel, q_tile=TQ, key_channels=Ck),
        out_shape=jax.ShapeDtypeStruct((N, Cout, HW), x.dtype),
        grid_spec=pltpu.PrefetchScalarGridSpec(
            num_scalar_prefetch=0,
            grid=(N, num_q),
            in_specs=[
                pl.BlockSpec((None, HW, Cin), lambda b, qi: (b, 0, 0)),  # x full (DMA'd once per batch)
                pl.BlockSpec((Cin, Ck),       lambda b, qi: (0, 0)),     # wk (bf16)
                pl.BlockSpec((1, Ck),         lambda b, qi: (0, 0)),     # bk
                pl.BlockSpec((Cin, Cv),       lambda b, qi: (0, 0)),     # wv (bf16)
                pl.BlockSpec((1, Cv),         lambda b, qi: (0, 0)),     # bv
                pl.BlockSpec((Cv, Cout),      lambda b, qi: (0, 0)),     # ww (bf16)
            ],
            out_specs=pl.BlockSpec((None, Cout, TQ), lambda b, qi: (b, 0, qi)),
            scratch_shapes=[
                pltpu.VMEM((HW, Ck), jnp.bfloat16),   # cached K (relu'd), per batch
                pltpu.VMEM((HW, Cv), jnp.bfloat16),   # cached V, per batch
            ],
        ),
        compiler_params=pltpu.CompilerParams(
            # qi must be "arbitrary": the per-batch K/V scratch carry must stay on
            # the core that owns the batch (megacore-safe on v7x).
            dimension_semantics=("parallel", "arbitrary"),
            vmem_limit_bytes=vmem_limit),
    )(x, wk_bf, bk, wv_bf, bv, ww_bf)

    # W bias added here (cheap XLA add) instead of a 1-lane (Cout,1) block per step.
    out_chw = out_chw + jnp.reshape(bw, (1, Cout, 1))
    # [N, Cout, HW] is already channels-first: reshape only, no transpose.
    return out_chw.reshape(N, Cout, H, W)


def _reference(x_nchw, wk, bk, wv, bv, ww, bw):
    """Pure-JAX (f32) reference mirroring the PyTorch forward (scale=1)."""
    N, Cin, H, W = x_nchw.shape
    x = jnp.transpose(x_nchw, (0, 2, 3, 1)).reshape(N, H * W, Cin)
    qk = jnp.maximum(x @ wk + bk, 0.0)                   # [N, HW, Ck]
    v = x @ wv + bv                                      # [N, HW, Cv]
    sim = jnp.einsum('nqc,nkc->nqk', qk, qk) * (wk.shape[1] ** -0.5)
    sim = jax.nn.softmax(sim, axis=-1)
    ctx = jnp.einsum('nqk,nkc->nqc', sim, v)             # [N, HW, Cv]
    out = ctx @ ww + bw                                  # [N, HW, Cout]
    return jnp.transpose(out.reshape(N, H, W, ww.shape[1]), (0, 3, 1, 2))


if __name__ == "__main__":
    # Small shapes consistent with the module.
    batch = 2
    in_channels = 4
    key_channels = 32
    value_channels = 32
    out_channels = in_channels          # out_channels=None -> in_channels
    H = W = 16                          # HW = 256

    key = jax.random.PRNGKey(0)
    k_x, k_wk, k_bk, k_wv, k_bv, k_ww, k_bw = jax.random.split(key, 7)

    x = jax.random.normal(k_x, (batch, in_channels, H, W), dtype=jnp.float32)

    # Parameters (1x1 convs stored as [Cin, Cout] matmul weights).
    # wk/bk: f_key (= f_query) conv with eval-mode BN folded in.
    wk = 0.1 * jax.random.normal(k_wk, (in_channels, key_channels), jnp.float32)
    bk = 0.1 * jax.random.normal(k_bk, (1, key_channels), jnp.float32)
    wv = 0.1 * jax.random.normal(k_wv, (in_channels, value_channels), jnp.float32)
    bv = 0.1 * jax.random.normal(k_bv, (1, value_channels), jnp.float32)
    # PyTorch zero-inits these; using non-zero deterministic values here.
    ww = 0.1 * jax.random.normal(k_ww, (value_channels, out_channels), jnp.float32)
    bw = 0.1 * jax.random.normal(k_bw, (1, out_channels), jnp.float32)

    # q_tile=128 with HW=256 -> num_q=2: exercises the per-batch K/V cache carry.
    out = self_attention_block(x, wk, bk, wv, bv, ww, bw, q_tile=128)
    out = jax.block_until_ready(out)

    ref = _reference(x, wk, bk, wv, bv, ww, bw)
    assert out.shape == (batch, out_channels, H, W), out.shape
    # bf16 MXU feeds + approx reciprocal -> relaxed (but still tight) tolerance.
    assert jnp.allclose(out, ref, atol=1e-2, rtol=1e-2), (
        "mismatch vs reference, max abs err = %e"
        % float(jnp.max(jnp.abs(out - ref))))

    print("KERNEL_OK")
</pallas_src>

<mosaic_0001>
module attributes {stable_mosaic.version = 11 : i64} {
  func.func @_self_attn_kernel(%arg0: i32, %arg1: i32, %arg2: memref<1x256x4xf32, #tpu.memory_space<vmem>>, %arg3: memref<4x32xbf16, #tpu.memory_space<vmem>>, %arg4: memref<1x32xf32, #tpu.memory_space<vmem>>, %arg5: memref<4x32xbf16, #tpu.memory_space<vmem>>, %arg6: memref<1x32xf32, #tpu.memory_space<vmem>>, %arg7: memref<32x4xbf16, #tpu.memory_space<vmem>>, %arg8: memref<1x4x128xf32, #tpu.memory_space<vmem>>, %arg9: memref<256x32xbf16, #tpu.memory_space<vmem>>, %arg10: memref<256x32xbf16, #tpu.memory_space<vmem>>) attributes {dimension_semantics = [#tpu.dimension_semantics<parallel>, #tpu.dimension_semantics<arbitrary>], iteration_bounds = array<i64: 2, 2>, scalar_prefetch = 0 : i64, scratch_operands = 2 : i64, tpu.core_type = #tpu.core_type<tc>, window_params = [{transform_indices = @transform_0, window_bounds = array<i64: 1, 256, 4>}, {pipeline_mode = #tpu.pipeline_mode<synchronous>, transform_indices = @transform_1, window_bounds = array<i64: 4, 32>}, {pipeline_mode = #tpu.pipeline_mode<synchronous>, transform_indices = @transform_2, window_bounds = array<i64: 1, 32>}, {pipeline_mode = #tpu.pipeline_mode<synchronous>, transform_indices = @transform_3, window_bounds = array<i64: 4, 32>}, {pipeline_mode = #tpu.pipeline_mode<synchronous>, transform_indices = @transform_4, window_bounds = array<i64: 1, 32>}, {pipeline_mode = #tpu.pipeline_mode<synchronous>, transform_indices = @transform_5, window_bounds = array<i64: 32, 4>}, {transform_indices = @transform_6, window_bounds = array<i64: 1, 4, 128>}]} {
    %c0_i32 = arith.constant 0 : i32
    %0 = arith.cmpi eq, %arg1, %c0_i32 : i32
    %1 = arith.extui %0 : i1 to i32
    %c0_i32_0 = arith.constant 0 : i32
    %2 = arith.cmpi ne, %1, %c0_i32_0 : i32
    scf.if %2 {
      %c0_15 = arith.constant 0 : index
      %c0_16 = arith.constant 0 : index
      %c0_17 = arith.constant 0 : index
      %32 = vector.load %arg2[%c0_15, %c0_16, %c0_17] : memref<1x256x4xf32, #tpu.memory_space<vmem>>, vector<1x256x4xf32>
      %33 = vector.shape_cast %32 : vector<1x256x4xf32> to vector<256x4xf32>
      %34 = arith.truncf %33 : vector<256x4xf32> to vector<256x4xbf16>
      %c0_18 = arith.constant 0 : index
      %c0_19 = arith.constant 0 : index
      %35 = vector.load %arg3[%c0_18, %c0_19] : memref<4x32xbf16, #tpu.memory_space<vmem>>, vector<4x32xbf16>
      %cst_20 = arith.constant dense<0.000000e+00> : vector<256x32xf32>
      %36 = tpu.matmul %34, %35, %cst_20 {dimension_numbers = #tpu.dot_dimension_numbers<[1], [0], [0], [1], [0, 0, 1, 1], [], []>} : vector<256x4xbf16>, vector<4x32xbf16>, vector<256x32xf32> -> vector<256x32xf32>
      %c0_21 = arith.constant 0 : index
      %c0_22 = arith.constant 0 : index
      %37 = vector.load %arg4[%c0_21, %c0_22] : memref<1x32xf32, #tpu.memory_space<vmem>>, vector<1x32xf32>
      %38 = vector.broadcast %37 : vector<1x32xf32> to vector<256x32xf32>
      %39 = arith.addf %36, %38 : vector<256x32xf32>
      %cst_23 = arith.constant 0.000000e+00 : f32
      %40 = vector.broadcast %cst_23 : f32 to vector<256x32xf32>
      %41 = arith.maximumf %39, %40 : vector<256x32xf32>
      %42 = arith.truncf %41 : vector<256x32xf32> to vector<256x32xbf16>
      %c0_24 = arith.constant 0 : index
      %c0_25 = arith.constant 0 : index
      %43 = vector.load %arg9[%c0_24, %c0_25] : memref<256x32xbf16, #tpu.memory_space<vmem>>, vector<256x32xbf16>
      tpu.vector_store %arg9[%c0_24, %c0_25], %42 {strides = array<i32>} : memref<256x32xbf16, #tpu.memory_space<vmem>>, vector<256x32xbf16>,
      %c0_26 = arith.constant 0 : index
      %c0_27 = arith.constant 0 : index
      %44 = vector.load %arg5[%c0_26, %c0_27] : memref<4x32xbf16, #tpu.memory_space<vmem>>, vector<4x32xbf16>
      %cst_28 = arith.constant dense<0.000000e+00> : vector<256x32xf32>
      %45 = tpu.matmul %34, %44, %cst_28 {dimension_numbers = #tpu.dot_dimension_numbers<[1], [0], [0], [1], [0, 0, 1, 1], [], []>} : vector<256x4xbf16>, vector<4x32xbf16>, vector<256x32xf32> -> vector<256x32xf32>
      %c0_29 = arith.constant 0 : index
      %c0_30 = arith.constant 0 : index
      %46 = vector.load %arg6[%c0_29, %c0_30] : memref<1x32xf32, #tpu.memory_space<vmem>>, vector<1x32xf32>
      %47 = vector.broadcast %46 : vector<1x32xf32> to vector<256x32xf32>
      %48 = arith.addf %45, %47 : vector<256x32xf32>
      %49 = arith.truncf %48 : vector<256x32xf32> to vector<256x32xbf16>
      %c0_31 = arith.constant 0 : index
      %c0_32 = arith.constant 0 : index
      %50 = vector.load %arg10[%c0_31, %c0_32] : memref<256x32xbf16, #tpu.memory_space<vmem>>, vector<256x32xbf16>
      tpu.vector_store %arg10[%c0_31, %c0_32], %49 {strides = array<i32>} : memref<256x32xbf16, #tpu.memory_space<vmem>>, vector<256x32xbf16>,
    } else {
    }
    %c128_i32 = arith.constant 128 : i32
    %3 = arith.muli %arg1, %c128_i32 : i32
    %4 = tpu.assume_multiple %3, 128 : i32
    %5 = arith.index_cast %4 : i32 to index
    %c0 = arith.constant 0 : index
    %6 = vector.load %arg9[%5, %c0] : memref<256x32xbf16, #tpu.memory_space<vmem>>, vector<128x32xbf16>
    %7 = arith.extf %6 : vector<128x32xbf16> to vector<128x32xf32>
    %cst = arith.constant 0.176776692 : f32
    %8 = vector.broadcast %cst : f32 to vector<128x32xf32>
    %9 = arith.mulf %7, %8 : vector<128x32xf32>
    %10 = arith.truncf %9 : vector<128x32xf32> to vector<128x32xbf16>
    %c0_1 = arith.constant 0 : index
    %c0_2 = arith.constant 0 : index
    %11 = vector.load %arg9[%c0_1, %c0_2] : memref<256x32xbf16, #tpu.memory_space<vmem>>, vector<256x32xbf16>
    %cst_3 = arith.constant dense<0.000000e+00> : vector<128x256xf32>
    %12 = tpu.matmul %10, %11, %cst_3 {dimension_numbers = #tpu.dot_dimension_numbers<[1], [1], [0], [0], [0, 0, 1, 0], [], []>} : vector<128x32xbf16>, vector<256x32xbf16>, vector<128x256xf32> -> vector<128x256xf32>
    %cst_4 = arith.constant dense<0xFF800000> : vector<128xf32>
    %13 = vector.multi_reduction <maximumf>, %12, %cst_4 [1] : vector<128x256xf32> to vector<128xf32>
    %14 = vector.shape_cast %13 : vector<128xf32> to vector<128x1xf32>
    %15 = vector.broadcast %14 : vector<128x1xf32> to vector<128x256xf32>
    %16 = arith.subf %12, %15 : vector<128x256xf32>
    %17 = math.exp %16 : vector<128x256xf32>
    %cst_5 = arith.constant dense<0.000000e+00> : vector<128xf32>
    %18 = vector.multi_reduction <add>, %17, %cst_5 [1] : vector<128x256xf32> to vector<128xf32>
    %19 = vector.shape_cast %18 : vector<128xf32> to vector<128x1xf32>
    %20 = tpu.reciprocal %19 {approx = true} : vector<128x1xf32> -> vector<128x1xf32>
    %21 = vector.broadcast %20 : vector<128x1xf32> to vector<128x256xf32>
    %22 = arith.mulf %17, %21 : vector<128x256xf32>
    %23 = arith.truncf %22 : vector<128x256xf32> to vector<128x256xbf16>
    %c0_6 = arith.constant 0 : index
    %c0_7 = arith.constant 0 : index
    %24 = vector.load %arg10[%c0_6, %c0_7] : memref<256x32xbf16, #tpu.memory_space<vmem>>, vector<256x32xbf16>
    %cst_8 = arith.constant dense<0.000000e+00> : vector<128x32xf32>
    %25 = tpu.matmul %23, %24, %cst_8 {dimension_numbers = #tpu.dot_dimension_numbers<[1], [0], [0], [1], [0, 0, 1, 1], [], []>} : vector<128x256xbf16>, vector<256x32xbf16>, vector<128x32xf32> -> vector<128x32xf32>
    %c0_9 = arith.constant 0 : index
    %c0_10 = arith.constant 0 : index
    %26 = vector.load %arg7[%c0_9, %c0_10] : memref<32x4xbf16, #tpu.memory_space<vmem>>, vector<32x4xbf16>
    %27 = arith.truncf %25 : vector<128x32xf32> to vector<128x32xbf16>
    %cst_11 = arith.constant dense<0.000000e+00> : vector<4x128xf32>
    %28 = tpu.matmul %26, %27, %cst_11 {dimension_numbers = #tpu.dot_dimension_numbers<[0], [1], [1], [0], [0, 1, 1, 0], [], []>} : vector<32x4xbf16>, vector<128x32xbf16>, vector<4x128xf32> -> vector<4x128xf32>
    %c0_12 = arith.constant 0 : index
    %c0_13 = arith.constant 0 : index
    %c0_14 = arith.constant 0 : index
    %29 = vector.load %arg8[%c0_12, %c0_13, %c0_14] : memref<1x4x128xf32, #tpu.memory_space<vmem>>, vector<1x4x128xf32>
    %30 = vector.shape_cast %29 : vector<1x4x128xf32> to vector<4x128xf32>
    %31 = vector.shape_cast %28 : vector<4x128xf32> to vector<1x4x128xf32>
    tpu.vector_store %arg8[%c0_12, %c0_13, %c0_14], %31 {strides = array<i32>} : memref<1x4x128xf32, #tpu.memory_space<vmem>>, vector<1x4x128xf32>,
    return
  }
  func.func @transform_0(%arg0: i32, %arg1: i32) -> (i32, i32, i32) {
    %c0_i32 = arith.constant 0 : i32
    %c0_i32_0 = arith.constant 0 : i32
    %c0_i32_1 = arith.constant 0 : i32
    return %arg0, %c0_i32, %c0_i32_0 : i32, i32, i32
  }
  func.func @transform_1(%arg0: i32, %arg1: i32) -> (i32, i32) {
    %c0_i32 = arith.constant 0 : i32
    %c0_i32_0 = arith.constant 0 : i32
    %c0_i32_1 = arith.constant 0 : i32
    return %c0_i32, %c0_i32_0 : i32, i32
  }
  func.func @transform_2(%arg0: i32, %arg1: i32) -> (i32, i32) {
    %c0_i32 = arith.constant 0 : i32
    %c0_i32_0 = arith.constant 0 : i32
    %c0_i32_1 = arith.constant 0 : i32
    return %c0_i32, %c0_i32_0 : i32, i32
  }
  func.func @transform_3(%arg0: i32, %arg1: i32) -> (i32, i32) {
    %c0_i32 = arith.constant 0 : i32
    %c0_i32_0 = arith.constant 0 : i32
    %c0_i32_1 = arith.constant 0 : i32
    return %c0_i32, %c0_i32_0 : i32, i32
  }
  func.func @transform_4(%arg0: i32, %arg1: i32) -> (i32, i32) {
    %c0_i32 = arith.constant 0 : i32
    %c0_i32_0 = arith.constant 0 : i32
    %c0_i32_1 = arith.constant 0 : i32
    return %c0_i32, %c0_i32_0 : i32, i32
  }
  func.func @transform_5(%arg0: i32, %arg1: i32) -> (i32, i32) {
    %c0_i32 = arith.constant 0 : i32
    %c0_i32_0 = arith.constant 0 : i32
    %c0_i32_1 = arith.constant 0 : i32
    return %c0_i32, %c0_i32_0 : i32, i32
  }
  func.func @transform_6(%arg0: i32, %arg1: i32) -> (i32, i32, i32) {
    %c0_i32 = arith.constant 0 : i32
    %c0_i32_0 = arith.constant 0 : i32
    return %arg0, %c0_i32, %arg1 : i32, i32, i32
  }
}

</mosaic_0001>

<bundles_post_ra>
// kernel: tpu_custom_call.1
= control target key start
LH: loop header
LB: loop body
LE: loop exit
PB: predicated region body
PF: predicated region fallthrough
CT: control target
= control target key end

     0   :  { %11 = vsyncpa [#allocation5], 0  ;;  %s3630_s0 = inlined_call_operand.vmem [shape: f32[2,256,4], index: 0, kind: input, shape index: {}]   ;;  %s3631_s1 = inlined_call_operand.vmem [shape: bf16[4,32], index: 1, kind: input, shape index: {}]   ;;  %s3632_s2 = inlined_call_operand.vmem [shape: f32[1,32], index: 2, kind: input, shape index: {}]   ;;  %s3633_s3 = inlined_call_operand.vmem [shape: bf16[4,32], index: 3, kind: input, shape index: {}]   ;;  %s3634_s4 = inlined_call_operand.vmem [shape: f32[1,32], index: 4, kind: input, shape index: {}]   ;;  %s3635_s5 = inlined_call_operand.vmem [shape: bf16[32,4], index: 5, kind: input, shape index: {}]   ;;  %s3636_s6 = inlined_call_operand.hbm [shape: f32[2,4,256], index: 6, kind: output, shape index: {}]  }
   0x1   :  { %13 = vsyncpa [#allocation5 + $0x1], 0  ;;  %s2936_s21 = smov 0   ;;  %s2938_s22 = smov 0  }
   0x2   :  { %s2940_s23 = smov 0   ;;  %s2942_s24 = smov 0  }
   0x3   :  { %s2944_s25 = smov 0   ;;  %s2946_s26 = smov 0  }
   0x4   :  { %s2948_s27 = smov 0   ;;  %s2950_s28 = smov 0  }
   0x5 LB: > { %s2102_s29 = sadd.s32 4294967295, %s2896_s28   ;;  %s2103_s30 = sadd.s32 4294967294, %s2896_s28   ;;  %s2896_s28 = sphi %s2950_s28, %s19_s28   ;;  %s2892_s27 = sphi %s2948_s27, %s3645_s27   ;;  %s2888_s26 = sphi %s2946_s26, %s3644_s26   ;;  %s2884_s25 = sphi %s2944_s25, %s3643_s25   ;;  %s2880_s24 = sphi %s2942_s24, %s3642_s24   ;;  %s2876_s23 = sphi %s2940_s23, %s3641_s23   ;;  %s2872_s22 = sphi %s2938_s22, %s3640_s22   ;;  %s2868_s21 = sphi %s2936_s21, %s3639_s21  }
   0x6   : > { %s28_s7 = sadd.s32 1, %s2888_s26  ;;  %s31_s8 = sadd.s32 1, %s2892_s27 }
   0x7   : > { %p29_p0 = scmp.ge.s32.totalorder %s28_s7, 2  ;;  %p181_p1 = scmp.ne.s32.totalorder %s2876_s23, %s2872_s22 }
   0x8   : > { %p182_p2 = scmp.eq.s32.totalorder %s2102_s29, 3  ;;  %p187_p5 = scmp.ne.s32.totalorder %s2872_s22, %s2868_s21 }
   0x9   : > { %s3647_s7 = smov (%p29_p0, %s28_s7), 0  ;;  %s3649_s8 = smov (!%p29_p0, %s31_s8), %s2892_s27 }
   0xa   : > { %s167_s9 = ssub.s32 %s2888_s26, %s3647_s7  ;;  %p2987_p3 = por %p182_p2, %p181_p1 }
   0xb   : > { %p33_p4 = scmp.ge.s32.totalorder %s3649_s8, 2  ;;  %p188_p6 = scmp.eq.s32.totalorder %s2103_s30, 3 }
   0xc   : > { %p2106_p7 = scmp.ge.s32.totalorder %s2896_s28, 1  ;;  %p229_p9 = scmp.lt.s32.totalorder %s2896_s28, 5 }
   0xd   : > { %s3651_s8 = smov (%p33_p4, %s3649_s8), 0  ;;  %p2996_p8 = por %p188_p6, %p187_p5 }
   0xe   : > { %s166_s12 = ssub.s32 %s2892_s27, %s3651_s8  ;;  %s171_s13 = sadd.s32 1, %s2876_s23 }
   0xf   : > { %s168_s14 = sor.u32 %s167_s9, %s166_s12  ;;  %p230_p10 = pnand %p2106_p7, %p229_p9 }
  0x10   : > { %p169_p11 = scmp.eq.s32.totalorder %s168_s14, 0  ;;  %s256_s16 = sand.u32 (!%p230_p10), 1, %s2872_s22  }
  0x11   : > { %233 = sbr.rel (%p230_p10) target bundleno = 1414 (0x586), region = 44  ;;  %p259_p12 = scmp.lt.s32.totalorder (!%p230_p10), %s2884_s25, 1 }
  0x12   : > { %s3005_s15 = scalar_select %p169_p11, %s2876_s23, %s171_s13  }
  0x13   : > { %s3011_s17 = sshll.u32 (!%p230_p10), %s256_s16, 2  ;;  %p2110_p13 = scmp.ne.s32.totalorder (!%p230_p10), %s2880_s24, 0 }
  0x14   : > { %s258_s9 = scalar_lea.vmem (!%p230_p10), [#allocation4], %s3011_s17 }
  0x16   : > { %s260_s18 = scalar_select %p259_p12, %s2884_s25, 1 }
  0x17   : > { %268 = sbr.rel (%p2110_p13) target bundleno = 296 (0x128), region = 48 }
  0x18   : > { %s2259_s19 = sshll.u32 %s260_s18, 8 }
  0x19   : > { %s3017_s30 = scalar_lea.vmem %s3630_s0, %s2259_s19 }
  0x1c   : > { %v317_v0 = vld [vmem:[%s3631_s1] sm:$0x3]  ;;  %vm374_vm0 = vcmask 1041408   ;;  %v270_v5 = vld [vmem:[%s3017_s30 + $0x8] sm:$0xff]  ;;  %vm325_vm1 = vcmask 31744   ;;  %v271_v6 = vld [vmem:[%s3017_s30 + $0x10] sm:$0xff] }
  0x1d   : > { %v732_v1 = vld [vmem:[%s3633_s3] sm:$0x3]  ;;  %2590 = vmatprep.subr.msk.bf16.mxu0 %vm374_vm0, %v317_v0  ;;  %v376_v3 = vsel %vm374_vm0, %v317_v0, 0  ;;  %v272_v7 = vld [vmem:[%s3017_s30 + $0x18] sm:$0xff]  ;;  %v274_v11 = vld [vmem:[%s3017_s30 + $0x28] sm:$0xff]  ;;  %vm699_vm2 = vcmask 257024  }
  0x1e   : > { %v269_v2 = vld [vmem:[%s3017_s30] sm:$0xff]  ;;  %2591 = vmatprep.subr.msk.bf16.mxu1 %vm374_vm0, %v732_v1  ;;  %v741_v4 = vsel %vm374_vm0, %v732_v1, 0  ;;  %2503 = vmatpush3.bf16.msra.mxu0 %v376_v3  ;;  %v302_v9 = vpack.c.bf16 %v272_v7, %v271_v6  ;;  %v275_v13 = vld [vmem:[%s3017_s30 + $0x30] sm:$0xff]  ;;  %v276_v14 = vld [vmem:[%s3017_s30 + $0x38] sm:$0xff] }
  0x1f   : > { %2537 = vmatpush3.bf16.msra.mxu1 %v741_v4  ;;  %v301_v8 = vpack.c.bf16 %v270_v5, %v269_v2  ;;  %v273_v10 = vld [vmem:[%s3017_s30 + $0x20] sm:$0xff]  ;;  %v278_v16 = vld [vmem:[%s3017_s30 + $0x48] sm:$0xff]  ;;  %v304_v17 = vpack.c.bf16 %v276_v14, %v275_v13  ;;  %v279_v19 = vld [vmem:[%s3017_s30 + $0x50] sm:$0xff] }
  0x20   : > { %v303_v12 = vpack.c.bf16 %v274_v11, %v273_v10  ;;  %v277_v15 = vld [vmem:[%s3017_s30 + $0x40] sm:$0xff]  ;;  %v280_v20 = vld [vmem:[%s3017_s30 + $0x58] sm:$0xff]  ;;  %v282_v22 = vld [vmem:[%s3017_s30 + $0x68] sm:$0xff] }
  0x21   : > { %2504 = vmatprep.mubr.msk.bf16.mxu0 %vm325_vm1, %v301_v8  ;;  %2538 = vmatprep.mubr.msk.bf16.mxu1 %vm325_vm1, %v301_v8  ;;  %v305_v18 = vpack.c.bf16 %v278_v16, %v277_v15  ;;  %v281_v21 = vld [vmem:[%s3017_s30 + $0x60] sm:$0xff]  ;;  %v306_v23 = vpack.c.bf16 %v280_v20, %v279_v19  ;;  %v283_v25 = vld [vmem:[%s3017_s30 + $0x70] sm:$0xff]  ;;  %v284_v26 = vld [vmem:[%s3017_s30 + $0x78] sm:$0xff] }
  0x22   : > { %2505 = vmatmul.mubr.msk.bf16.vlgmr.msra.gmra.mxu0 %vm325_vm1, %v302_v9  ;;  %2539 = vmatmul.mubr.msk.bf16.vlgmr.msra.gmra.mxu1 %vm325_vm1, %v302_v9  ;;  %v307_v24 = vpack.c.bf16 %v282_v22, %v281_v21  ;;  %v285_v27 = vld [vmem:[%s3017_s30 + $0x80] sm:$0xff]  ;;  %v286_v28 = vld [vmem:[%s3017_s30 + $0x88] sm:$0xff]  ;;  %v308_v29 = vpack.c.bf16 %v284_v26, %v283_v25  ;;  %v287_v31 = vld [vmem:[%s3017_s30 + $0x90] sm:$0xff] }
  0x23   : > { %2508 = vmatprep.mubr.msk.bf16.mxu0 %vm325_vm1, %v303_v12  ;;  %2542 = vmatprep.mubr.msk.bf16.mxu1 %vm325_vm1, %v303_v12  ;;  %v309_v30 = vpack.c.bf16 %v286_v28, %v285_v27  ;;  %v288_v32 = vld [vmem:[%s3017_s30 + $0x98] sm:$0xff]  ;;  %v289_v33 = vld [vmem:[%s3017_s30 + $0xa0] sm:$0xff]  ;;  %v290_v34 = vld [vmem:[%s3017_s30 + $0xa8] sm:$0xff] }
  0x24   : > { %v310_v35 = vpack.c.bf16 %v288_v32, %v287_v31  ;;  %v311_v36 = vpack.c.bf16 %v290_v34, %v289_v33  ;;  %v291_v37 = vld [vmem:[%s3017_s30 + $0xb0] sm:$0xff]  ;;  %v292_v38 = vld [vmem:[%s3017_s30 + $0xb8] sm:$0xff]  ;;  %v293_v39 = vld [vmem:[%s3017_s30 + $0xc0] sm:$0xff] }
  0x25   : > { %v294_v40 = vld [vmem:[%s3017_s30 + $0xc8] sm:$0xff]  ;;  %v312_v41 = vpack.c.bf16 %v292_v38, %v291_v37  ;;  %v295_v43 = vld [vmem:[%s3017_s30 + $0xd0] sm:$0xff]  ;;  %v296_v44 = vld [vmem:[%s3017_s30 + $0xd8] sm:$0xff] }
  0x26   : > { %v313_v42 = vpack.c.bf16 %v294_v40, %v293_v39  ;;  %v297_v45 = vld [vmem:[%s3017_s30 + $0xe0] sm:$0xff]  ;;  %v298_v46 = vld [vmem:[%s3017_s30 + $0xe8] sm:$0xff]  ;;  %v314_v47 = vpack.c.bf16 %v296_v44, %v295_v43  ;;  %v299_v49 = vld [vmem:[%s3017_s30 + $0xf0] sm:$0xff] }
  0x27   : > { %v315_v48 = vpack.c.bf16 %v298_v46, %v297_v45  ;;  %v300_v50 = vld [vmem:[%s3017_s30 + $0xf8] sm:$0xff]  ;;  %v3094_v52 = vld [vmem:[%s3632_s2] ss:$0 sm:$0xff] }
  0x28   : > { %v316_v51 = vpack.c.bf16 %v300_v50, %v299_v49  ;;  %v3099_v53 = vld [vmem:[%s3634_s4] ss:$0 sm:$0xff] }
  0x2a   : > { %2509 = vmatmul.mubr.msk.bf16.gmra.mxu0 %vm325_vm1, %v304_v17  ;;  %2543 = vmatmul.mubr.msk.bf16.gmra.mxu1 %vm325_vm1, %v304_v17 }
  0x2b   : > { %2512 = vmatprep.mubr.msk.bf16.mxu0 %vm325_vm1, %v305_v18  ;;  %2546 = vmatprep.mubr.msk.bf16.mxu1 %vm325_vm1, %v305_v18 }
  0x32   : > { %2513 = vmatmul.mubr.msk.bf16.gmra.mxu0 %vm325_vm1, %v306_v23  ;;  %2547 = vmatmul.mubr.msk.bf16.gmra.mxu1 %vm325_vm1, %v306_v23 }
  0x33   : > { %2516 = vmatprep.mubr.msk.bf16.mxu0 %vm325_vm1, %v307_v24  ;;  %2550 = vmatprep.mubr.msk.bf16.mxu1 %vm325_vm1, %v307_v24 }
  0x3a   : > { %2517 = vmatmul.mubr.msk.bf16.gmra.mxu0 %vm325_vm1, %v308_v29  ;;  %2551 = vmatmul.mubr.msk.bf16.gmra.mxu1 %vm325_vm1, %v308_v29 }
  0x3b   : > { %2520 = vmatprep.mubr.msk.bf16.mxu0 %vm325_vm1, %v309_v30  ;;  %2554 = vmatprep.mubr.msk.bf16.mxu1 %vm325_vm1, %v309_v30 }
  0x42   : > { %2521 = vmatmul.mubr.msk.bf16.gmra.mxu0 %vm325_vm1, %v310_v35  ;;  %2555 = vmatmul.mubr.msk.bf16.gmra.mxu1 %vm325_vm1, %v310_v35 }
  0x43   : > { %2524 = vmatprep.mubr.msk.bf16.mxu0 %vm325_vm1, %v311_v36  ;;  %2558 = vmatprep.mubr.msk.bf16.mxu1 %vm325_vm1, %v311_v36 }
  0x4a   : > { %2525 = vmatmul.mubr.msk.bf16.gmra.mxu0 %vm325_vm1, %v312_v41  ;;  %2559 = vmatmul.mubr.msk.bf16.gmra.mxu1 %vm325_vm1, %v312_v41 }
  0x4b   : > { %2528 = vmatprep.mubr.msk.bf16.mxu0 %vm325_vm1, %v313_v42  ;;  %2562 = vmatprep.mubr.msk.bf16.mxu1 %vm325_vm1, %v313_v42 }
  0x52   : > { %2529 = vmatmul.mubr.msk.bf16.gmra.mxu0 %vm325_vm1, %v314_v47  ;;  %2563 = vmatmul.mubr.msk.bf16.gmra.mxu1 %vm325_vm1, %v314_v47 }
  0x53   : > { %2532 = vmatprep.mubr.msk.bf16.mxu0 %vm325_vm1, %v315_v48  ;;  %2566 = vmatprep.mubr.msk.bf16.mxu1 %vm325_vm1, %v315_v48 }
  0x5a   : > { %2533 = vmatmul.mubr.msk.bf16.gmra.mxu0 %vm325_vm1, %v316_v51  ;;  %2567 = vmatmul.mubr.msk.bf16.gmra.mxu1 %vm325_vm1, %v316_v51 }
  0xe2   : > { %v2506_v54 = vpop.f32.mrf.mxu0  ;;  %v2540_v55 = vpop.f32.mrf.mxu1 }
  0xe3   : > { %v421_v56 = vadd.f32 %v2506_v54, %v3094_v52  ;;  %v786_v57 = vadd.f32 %v2540_v55, %v3099_v53 }
  0xe4   : > { %v412_v58 = vpop.f32.mrf.mxu0  ;;  %v777_v59 = vpop.f32.mrf.mxu1 }
  0xe5   : > { %v541_v60 = vmax.f32 %v421_v56, 0.0  ;;  %v2294_v61 = vpack.c.bf16 %v786_v57, %v786_v57  ;;  %v413_v62 = vadd.f32 %v3094_v52, %v412_v58  ;;  %v778_v63 = vadd.f32 %v3099_v53, %v777_v59 }
  0xe6   : > { %v2507_v0 = vpop.f32.mrf.mxu0  ;;  %v2541_v1 = vpop.f32.mrf.mxu1 }
  0xe7   : > { %v2262_v2 = vpack.c.bf16 %v541_v60, %v541_v60  ;;  %1034 = vst.msk [vmem:[#allocation3 + $0x8] sm:$0xf] %vm699_vm2, %v2294_v61  ;;  %v539_v3 = vmax.f32 %v413_v62, 0.0  ;;  %v2292_v4 = vpack.c.bf16 %v778_v63, %v778_v63  ;;  %v424_v5 = vadd.f32 %v2507_v0, %v3094_v52 }
  0xe8   : > { %v789_v6 = vadd.f32 %v2541_v1, %v3099_v53  ;;  %v415_v7 = vpop.f32.mrf.mxu0  ;;  %v780_v8 = vpop.f32.mrf.mxu1 }
  0xe9   : > { %702 = vst.msk [vmem:[#allocation2 + $0x8] sm:$0xf] %vm699_vm2, %v2262_v2  ;;  %v2260_v9 = vpack.c.bf16 %v539_v3, %v539_v3  ;;  %1032 = vst.msk [vmem:[#allocation3] sm:$0xf] %vm699_vm2, %v2292_v4  ;;  %v542_v10 = vmax.f32 %v424_v5, 0.0  ;;  %v416_v11 = vadd.f32 %v3094_v52, %v415_v7  ;;  %v781_v12 = vadd.f32 %v3099_v53, %v780_v8 }
  0xea   : > { %v2295_v13 = vpack.c.bf16 %v789_v6, %v789_v6  ;;  %v2510_v14 = vpop.f32.mrf.mxu0  ;;  %v2544_v15 = vpop.f32.mrf.mxu1 }
  0xeb   : > { %700 = vst.msk [vmem:[#allocation2] sm:$0xf] %vm699_vm2, %v2260_v9  ;;  %v2263_v16 = vpack.c.bf16 %v542_v10, %v542_v10  ;;  %v540_v17 = vmax.f32 %v416_v11, 0.0  ;;  %v2293_v18 = vpack.c.bf16 %v781_v12, %v781_v12  ;;  %v437_v19 = vadd.f32 %v2510_v14, %v3094_v52 }
  0xec   : > { %1035 = vst.msk [vmem:[#allocation3 + $0xc] sm:$0xf] %vm699_vm2, %v2295_v13  ;;  %v802_v20 = vadd.f32 %v2544_v15, %v3099_v53  ;;  %v428_v21 = vpop.f32.mrf.mxu0  ;;  %v793_v22 = vpop.f32.mrf.mxu1 }
  0xed   : > { %703 = vst.msk [vmem:[#allocation2 + $0xc] sm:$0xf] %vm699_vm2, %v2263_v16  ;;  %v2261_v23 = vpack.c.bf16 %v540_v17, %v540_v17  ;;  %1033 = vst.msk [vmem:[#allocation3 + $0x4] sm:$0xf] %vm699_vm2, %v2293_v18  ;;  %v545_v24 = vmax.f32 %v437_v19, 0.0  ;;  %v429_v25 = vadd.f32 %v3094_v52, %v428_v21  ;;  %v794_v26 = vadd.f32 %v3099_v53, %v793_v22 }
  0xee   : > { %v2298_v27 = vpack.c.bf16 %v802_v20, %v802_v20  ;;  %v2511_v28 = vpop.f32.mrf.mxu0  ;;  %v2545_v29 = vpop.f32.mrf.mxu1 }
  0xef   : > { %701 = vst.msk [vmem:[#allocation2 + $0x4] sm:$0xf] %vm699_vm2, %v2261_v23  ;;  %v2266_v30 = vpack.c.bf16 %v545_v24, %v545_v24  ;;  %v543_v31 = vmax.f32 %v429_v25, 0.0  ;;  %v2296_v32 = vpack.c.bf16 %v794_v26, %v794_v26  ;;  %v440_v33 = vadd.f32 %v2511_v28, %v3094_v52 }
  0xf0   : > { %1038 = vst.msk [vmem:[#allocation3 + $0x18] sm:$0xf] %vm699_vm2, %v2298_v27  ;;  %v805_v34 = vadd.f32 %v2545_v29, %v3099_v53  ;;  %v431_v35 = vpop.f32.mrf.mxu0  ;;  %v796_v36 = vpop.f32.mrf.mxu1 }
  0xf1   : > { %706 = vst.msk [vmem:[#allocation2 + $0x18] sm:$0xf] %vm699_vm2, %v2266_v30  ;;  %v2264_v37 = vpack.c.bf16 %v543_v31, %v543_v31  ;;  %1036 = vst.msk [vmem:[#allocation3 + $0x10] sm:$0xf] %vm699_vm2, %v2296_v32  ;;  %v546_v38 = vmax.f32 %v440_v33, 0.0  ;;  %v432_v39 = vadd.f32 %v3094_v52, %v431_v35  ;;  %v797_v40 = vadd.f32 %v3099_v53, %v796_v36 }
  0xf2   : > { %v2299_v41 = vpack.c.bf16 %v805_v34, %v805_v34  ;;  %v2514_v42 = vpop.f32.mrf.mxu0  ;;  %v2548_v43 = vpop.f32.mrf.mxu1 }
  0xf3   : > { %704 = vst.msk [vmem:[#allocation2 + $0x10] sm:$0xf] %vm699_vm2, %v2264_v37  ;;  %v2267_v44 = vpack.c.bf16 %v546_v38, %v546_v38  ;;  %v544_v45 = vmax.f32 %v432_v39, 0.0  ;;  %v2297_v46 = vpack.c.bf16 %v797_v40, %v797_v40  ;;  %v453_v47 = vadd.f32 %v2514_v42, %v3094_v52 }
  0xf4   : > { %1039 = vst.msk [vmem:[#allocation3 + $0x1c] sm:$0xf] %vm699_vm2, %v2299_v41  ;;  %v818_v48 = vadd.f32 %v2548_v43, %v3099_v53  ;;  %v444_v49 = vpop.f32.mrf.mxu0  ;;  %v809_v50 = vpop.f32.mrf.mxu1 }
  0xf5   : > { %707 = vst.msk [vmem:[#allocation2 + $0x1c] sm:$0xf] %vm699_vm2, %v2267_v44  ;;  %v2265_v51 = vpack.c.bf16 %v544_v45, %v544_v45  ;;  %1037 = vst.msk [vmem:[#allocation3 + $0x14] sm:$0xf] %vm699_vm2, %v2297_v46  ;;  %v549_v54 = vmax.f32 %v453_v47, 0.0  ;;  %v445_v55 = vadd.f32 %v3094_v52, %v444_v49  ;;  %v810_v56 = vadd.f32 %v3099_v53, %v809_v50 }
  0xf6   : > { %v2302_v57 = vpack.c.bf16 %v818_v48, %v818_v48  ;;  %v2515_v58 = vpop.f32.mrf.mxu0  ;;  %v2549_v59 = vpop.f32.mrf.mxu1 }
  0xf7   : > { %705 = vst.msk [vmem:[#allocation2 + $0x14] sm:$0xf] %vm699_vm2, %v2265_v51  ;;  %v2270_v60 = vpack.c.bf16 %v549_v54, %v549_v54  ;;  %v547_v61 = vmax.f32 %v445_v55, 0.0  ;;  %v2300_v62 = vpack.c.bf16 %v810_v56, %v810_v56  ;;  %v456_v63 = vadd.f32 %v2515_v58, %v3094_v52 }
  0xf8   : > { %1042 = vst.msk [vmem:[#allocation3 + $0x28] sm:$0xf] %vm699_vm2, %v2302_v57  ;;  %v821_v0 = vadd.f32 %v2549_v59, %v3099_v53  ;;  %v447_v1 = vpop.f32.mrf.mxu0  ;;  %v812_v2 = vpop.f32.mrf.mxu1 }
  0xf9   : > { %710 = vst.msk [vmem:[#allocation2 + $0x28] sm:$0xf] %vm699_vm2, %v2270_v60  ;;  %v2268_v3 = vpack.c.bf16 %v547_v61, %v547_v61  ;;  %1040 = vst.msk [vmem:[#allocation3 + $0x20] sm:$0xf] %vm699_vm2, %v2300_v62  ;;  %v550_v4 = vmax.f32 %v456_v63, 0.0  ;;  %v448_v5 = vadd.f32 %v3094_v52, %v447_v1  ;;  %v813_v6 = vadd.f32 %v3099_v53, %v812_v2 }
  0xfa   : > { %v2303_v7 = vpack.c.bf16 %v821_v0, %v821_v0  ;;  %v2518_v8 = vpop.f32.mrf.mxu0  ;;  %v2552_v9 = vpop.f32.mrf.mxu1 }
  0xfb   : > { %708 = vst.msk [vmem:[#allocation2 + $0x20] sm:$0xf] %vm699_vm2, %v2268_v3  ;;  %v2271_v10 = vpack.c.bf16 %v550_v4, %v550_v4  ;;  %v548_v11 = vmax.f32 %v448_v5, 0.0  ;;  %v2301_v12 = vpack.c.bf16 %v813_v6, %v813_v6  ;;  %v469_v13 = vadd.f32 %v2518_v8, %v3094_v52 }
  0xfc   : > { %1043 = vst.msk [vmem:[#allocation3 + $0x2c] sm:$0xf] %vm699_vm2, %v2303_v7  ;;  %v834_v14 = vadd.f32 %v2552_v9, %v3099_v53  ;;  %v460_v15 = vpop.f32.mrf.mxu0  ;;  %v825_v16 = vpop.f32.mrf.mxu1 }
  0xfd   : > { %711 = vst.msk [vmem:[#allocation2 + $0x2c] sm:$0xf] %vm699_vm2, %v2271_v10  ;;  %v2269_v17 = vpack.c.bf16 %v548_v11, %v548_v11  ;;  %1041 = vst.msk [vmem:[#allocation3 + $0x24] sm:$0xf] %vm699_vm2, %v2301_v12  ;;  %v553_v18 = vmax.f32 %v469_v13, 0.0  ;;  %v461_v19 = vadd.f32 %v3094_v52, %v460_v15  ;;  %v826_v20 = vadd.f32 %v3099_v53, %v825_v16 }
  0xfe   : > { %v2306_v21 = vpack.c.bf16 %v834_v14, %v834_v14  ;;  %v2519_v22 = vpop.f32.mrf.mxu0  ;;  %v2553_v23 = vpop.f32.mrf.mxu1 }
  0xff   : > { %709 = vst.msk [vmem:[#allocation2 + $0x24] sm:$0xf] %vm699_vm2, %v2269_v17  ;;  %v2274_v24 = vpack.c.bf16 %v553_v18, %v553_v18  ;;  %v551_v25 = vmax.f32 %v461_v19, 0.0  ;;  %v2304_v26 = vpack.c.bf16 %v826_v20, %v826_v20  ;;  %v472_v27 = vadd.f32 %v2519_v22, %v3094_v52 }
 0x100   : > { %1046 = vst.msk [vmem:[#allocation3 + $0x38] sm:$0xf] %vm699_vm2, %v2306_v21  ;;  %v837_v28 = vadd.f32 %v2553_v23, %v3099_v53  ;;  %v463_v29 = vpop.f32.mrf.mxu0  ;;  %v828_v30 = vpop.f32.mrf.mxu1 }
 0x101   : > { %714 = vst.msk [vmem:[#allocation2 + $0x38] sm:$0xf] %vm699_vm2, %v2274_v24  ;;  %v2272_v31 = vpack.c.bf16 %v551_v25, %v551_v25  ;;  %1044 = vst.msk [vmem:[#allocation3 + $0x30] sm:$0xf] %vm699_vm2, %v2304_v26  ;;  %v554_v32 = vmax.f32 %v472_v27, 0.0  ;;  %v464_v33 = vadd.f32 %v3094_v52, %v463_v29  ;;  %v829_v34 = vadd.f32 %v3099_v53, %v828_v30 }
 0x102   : > { %v2307_v35 = vpack.c.bf16 %v837_v28, %v837_v28  ;;  %v2522_v36 = vpop.f32.mrf.mxu0  ;;  %v2556_v37 = vpop.f32.mrf.mxu1 }
 0x103   : > { %712 = vst.msk [vmem:[#allocation2 + $0x30] sm:$0xf] %vm699_vm2, %v2272_v31  ;;  %v2275_v38 = vpack.c.bf16 %v554_v32, %v554_v32  ;;  %v552_v39 = vmax.f32 %v464_v33, 0.0  ;;  %v2305_v40 = vpack.c.bf16 %v829_v34, %v829_v34  ;;  %v485_v41 = vadd.f32 %v2522_v36, %v3094_v52 }
 0x104   : > { %1047 = vst.msk [vmem:[#allocation3 + $0x3c] sm:$0xf] %vm699_vm2, %v2307_v35  ;;  %v850_v42 = vadd.f32 %v2556_v37, %v3099_v53  ;;  %v476_v43 = vpop.f32.mrf.mxu0  ;;  %v841_v44 = vpop.f32.mrf.mxu1 }
 0x105   : > { %715 = vst.msk [vmem:[#allocation2 + $0x3c] sm:$0xf] %vm699_vm2, %v2275_v38  ;;  %v2273_v45 = vpack.c.bf16 %v552_v39, %v552_v39  ;;  %1045 = vst.msk [vmem:[#allocation3 + $0x34] sm:$0xf] %vm699_vm2, %v2305_v40  ;;  %v557_v46 = vmax.f32 %v485_v41, 0.0  ;;  %v477_v47 = vadd.f32 %v3094_v52, %v476_v43  ;;  %v842_v48 = vadd.f32 %v3099_v53, %v841_v44 }
 0x106   : > { %v2310_v49 = vpack.c.bf16 %v850_v42, %v850_v42  ;;  %v2523_v50 = vpop.f32.mrf.mxu0  ;;  %v2557_v51 = vpop.f32.mrf.mxu1 }
 0x107   : > { %713 = vst.msk [vmem:[#allocation2 + $0x34] sm:$0xf] %vm699_vm2, %v2273_v45  ;;  %v2278_v54 = vpack.c.bf16 %v557_v46, %v557_v46  ;;  %v555_v55 = vmax.f32 %v477_v47, 0.0  ;;  %v2308_v56 = vpack.c.bf16 %v842_v48, %v842_v48  ;;  %v488_v57 = vadd.f32 %v2523_v50, %v3094_v52 }
 0x108   : > { %1050 = vst.msk [vmem:[#allocation3 + $0x48] sm:$0xf] %vm699_vm2, %v2310_v49  ;;  %v853_v58 = vadd.f32 %v2557_v51, %v3099_v53  ;;  %v479_v59 = vpop.f32.mrf.mxu0  ;;  %v844_v60 = vpop.f32.mrf.mxu1 }
 0x109   : > { %718 = vst.msk [vmem:[#allocation2 + $0x48] sm:$0xf] %vm699_vm2, %v2278_v54  ;;  %v2276_v61 = vpack.c.bf16 %v555_v55, %v555_v55  ;;  %1048 = vst.msk [vmem:[#allocation3 + $0x40] sm:$0xf] %vm699_vm2, %v2308_v56  ;;  %v558_v62 = vmax.f32 %v488_v57, 0.0  ;;  %v480_v63 = vadd.f32 %v3094_v52, %v479_v59  ;;  %v845_v0 = vadd.f32 %v3099_v53, %v844_v60 }
 0x10a   : > { %v2311_v1 = vpack.c.bf16 %v853_v58, %v853_v58  ;;  %v2526_v2 = vpop.f32.mrf.mxu0  ;;  %v2560_v3 = vpop.f32.mrf.mxu1 }
 0x10b   : > { %716 = vst.msk [vmem:[#allocation2 + $0x40] sm:$0xf] %vm699_vm2, %v2276_v61  ;;  %v2279_v4 = vpack.c.bf16 %v558_v62, %v558_v62  ;;  %v556_v5 = vmax.f32 %v480_v63, 0.0  ;;  %v2309_v6 = vpack.c.bf16 %v845_v0, %v845_v0  ;;  %v501_v7 = vadd.f32 %v2526_v2, %v3094_v52 }
 0x10c   : > { %1051 = vst.msk [vmem:[#allocation3 + $0x4c] sm:$0xf] %vm699_vm2, %v2311_v1  ;;  %v866_v8 = vadd.f32 %v2560_v3, %v3099_v53  ;;  %v492_v9 = vpop.f32.mrf.mxu0  ;;  %v857_v10 = vpop.f32.mrf.mxu1 }
 0x10d   : > { %719 = vst.msk [vmem:[#allocation2 + $0x4c] sm:$0xf] %vm699_vm2, %v2279_v4  ;;  %v2277_v11 = vpack.c.bf16 %v556_v5, %v556_v5  ;;  %1049 = vst.msk [vmem:[#allocation3 + $0x44] sm:$0xf] %vm699_vm2, %v2309_v6  ;;  %v561_v12 = vmax.f32 %v501_v7, 0.0  ;;  %v493_v13 = vadd.f32 %v3094_v52, %v492_v9  ;;  %v858_v14 = vadd.f32 %v3099_v53, %v857_v10 }
 0x10e   : > { %v2314_v15 = vpack.c.bf16 %v866_v8, %v866_v8  ;;  %v2527_v16 = vpop.f32.mrf.mxu0  ;;  %v2561_v17 = vpop.f32.mrf.mxu1 }
 0x10f   : > { %717 = vst.msk [vmem:[#allocation2 + $0x44] sm:$0xf] %vm699_vm2, %v2277_v11  ;;  %v2282_v18 = vpack.c.bf16 %v561_v12, %v561_v12  ;;  %v559_v19 = vmax.f32 %v493_v13, 0.0  ;;  %v2312_v20 = vpack.c.bf16 %v858_v14, %v858_v14  ;;  %v504_v21 = vadd.f32 %v2527_v16, %v3094_v52 }
 0x110   : > { %1054 = vst.msk [vmem:[#allocation3 + $0x58] sm:$0xf] %vm699_vm2, %v2314_v15  ;;  %v869_v22 = vadd.f32 %v2561_v17, %v3099_v53  ;;  %v495_v23 = vpop.f32.mrf.mxu0  ;;  %v860_v24 = vpop.f32.mrf.mxu1 }
 0x111   : > { %722 = vst.msk [vmem:[#allocation2 + $0x58] sm:$0xf] %vm699_vm2, %v2282_v18  ;;  %v2280_v25 = vpack.c.bf16 %v559_v19, %v559_v19  ;;  %1052 = vst.msk [vmem:[#allocation3 + $0x50] sm:$0xf] %vm699_vm2, %v2312_v20  ;;  %v562_v26 = vmax.f32 %v504_v21, 0.0  ;;  %v496_v27 = vadd.f32 %v3094_v52, %v495_v23  ;;  %v861_v28 = vadd.f32 %v3099_v53, %v860_v24 }
 0x112   : > { %v2315_v29 = vpack.c.bf16 %v869_v22, %v869_v22  ;;  %v2530_v30 = vpop.f32.mrf.mxu0  ;;  %v2564_v31 = vpop.f32.mrf.mxu1 }
 0x113   : > { %720 = vst.msk [vmem:[#allocation2 + $0x50] sm:$0xf] %vm699_vm2, %v2280_v25  ;;  %v2283_v32 = vpack.c.bf16 %v562_v26, %v562_v26  ;;  %v560_v33 = vmax.f32 %v496_v27, 0.0  ;;  %v2313_v34 = vpack.c.bf16 %v861_v28, %v861_v28  ;;  %v517_v35 = vadd.f32 %v2530_v30, %v3094_v52 }
 0x114   : > { %1055 = vst.msk [vmem:[#allocation3 + $0x5c] sm:$0xf] %vm699_vm2, %v2315_v29  ;;  %v882_v36 = vadd.f32 %v2564_v31, %v3099_v53  ;;  %v508_v37 = vpop.f32.mrf.mxu0  ;;  %v873_v38 = vpop.f32.mrf.mxu1 }
 0x115   : > { %723 = vst.msk [vmem:[#allocation2 + $0x5c] sm:$0xf] %vm699_vm2, %v2283_v32  ;;  %v2281_v39 = vpack.c.bf16 %v560_v33, %v560_v33  ;;  %1053 = vst.msk [vmem:[#allocation3 + $0x54] sm:$0xf] %vm699_vm2, %v2313_v34  ;;  %v565_v40 = vmax.f32 %v517_v35, 0.0  ;;  %v509_v41 = vadd.f32 %v3094_v52, %v508_v37  ;;  %v874_v42 = vadd.f32 %v3099_v53, %v873_v38 }
 0x116   : > { %v2318_v43 = vpack.c.bf16 %v882_v36, %v882_v36  ;;  %v2531_v44 = vpop.f32.mrf.mxu0  ;;  %v2565_v45 = vpop.f32.mrf.mxu1 }
 0x117   : > { %721 = vst.msk [vmem:[#allocation2 + $0x54] sm:$0xf] %vm699_vm2, %v2281_v39  ;;  %v2286_v46 = vpack.c.bf16 %v565_v40, %v565_v40  ;;  %v563_v47 = vmax.f32 %v509_v41, 0.0  ;;  %v2316_v48 = vpack.c.bf16 %v874_v42, %v874_v42  ;;  %v520_v49 = vadd.f32 %v2531_v44, %v3094_v52 }
 0x118   : > { %1058 = vst.msk [vmem:[#allocation3 + $0x68] sm:$0xf] %vm699_vm2, %v2318_v43  ;;  %v885_v50 = vadd.f32 %v2565_v45, %v3099_v53  ;;  %v511_v51 = vpop.f32.mrf.mxu0  ;;  %v876_v54 = vpop.f32.mrf.mxu1 }
 0x119   : > { %726 = vst.msk [vmem:[#allocation2 + $0x68] sm:$0xf] %vm699_vm2, %v2286_v46  ;;  %v2284_v55 = vpack.c.bf16 %v563_v47, %v563_v47  ;;  %1056 = vst.msk [vmem:[#allocation3 + $0x60] sm:$0xf] %vm699_vm2, %v2316_v48  ;;  %v566_v56 = vmax.f32 %v520_v49, 0.0  ;;  %v512_v57 = vadd.f32 %v3094_v52, %v511_v51  ;;  %v877_v58 = vadd.f32 %v3099_v53, %v876_v54 }
 0x11a   : > { %v2319_v59 = vpack.c.bf16 %v885_v50, %v885_v50  ;;  %v2534_v60 = vpop.f32.mrf.mxu0  ;;  %v2568_v61 = vpop.f32.mrf.mxu1 }
 0x11b   : > { %724 = vst.msk [vmem:[#allocation2 + $0x60] sm:$0xf] %vm699_vm2, %v2284_v55  ;;  %v2287_v62 = vpack.c.bf16 %v566_v56, %v566_v56  ;;  %v564_v63 = vmax.f32 %v512_v57, 0.0  ;;  %v2317_v0 = vpack.c.bf16 %v877_v58, %v877_v58  ;;  %v533_v1 = vadd.f32 %v2534_v60, %v3094_v52 }
 0x11c   : > { %1059 = vst.msk [vmem:[#allocation3 + $0x6c] sm:$0xf] %vm699_vm2, %v2319_v59  ;;  %v898_v2 = vadd.f32 %v2568_v61, %v3099_v53  ;;  %v524_v3 = vpop.f32.mrf.mxu0  ;;  %v889_v4 = vpop.f32.mrf.mxu1 }
 0x11d   : > { %727 = vst.msk [vmem:[#allocation2 + $0x6c] sm:$0xf] %vm699_vm2, %v2287_v62  ;;  %v2285_v5 = vpack.c.bf16 %v564_v63, %v564_v63  ;;  %1057 = vst.msk [vmem:[#allocation3 + $0x64] sm:$0xf] %vm699_vm2, %v2317_v0  ;;  %v569_v6 = vmax.f32 %v533_v1, 0.0  ;;  %v525_v7 = vadd.f32 %v3094_v52, %v524_v3  ;;  %v890_v8 = vadd.f32 %v3099_v53, %v889_v4 }
 0x11e   : > { %v2322_v9 = vpack.c.bf16 %v898_v2, %v898_v2  ;;  %v2535_v10 = vpop.f32.mrf.mxu0  ;;  %v2569_v11 = vpop.f32.mrf.mxu1 }
 0x11f   : > { %725 = vst.msk [vmem:[#allocation2 + $0x64] sm:$0xf] %vm699_vm2, %v2285_v5  ;;  %v2290_v12 = vpack.c.bf16 %v569_v6, %v569_v6  ;;  %v567_v13 = vmax.f32 %v525_v7, 0.0  ;;  %v2320_v14 = vpack.c.bf16 %v890_v8, %v890_v8  ;;  %v536_v15 = vadd.f32 %v2535_v10, %v3094_v52 }
 0x120   : > { %1062 = vst.msk [vmem:[#allocation3 + $0x78] sm:$0xf] %vm699_vm2, %v2322_v9  ;;  %v901_v16 = vadd.f32 %v2569_v11, %v3099_v53  ;;  %v527_v17 = vpop.f32.mrf.mxu0  ;;  %v892_v18 = vpop.f32.mrf.mxu1 }
 0x121   : > { %730 = vst.msk [vmem:[#allocation2 + $0x78] sm:$0xf] %vm699_vm2, %v2290_v12  ;;  %v2288_v19 = vpack.c.bf16 %v567_v13, %v567_v13  ;;  %1060 = vst.msk [vmem:[#allocation3 + $0x70] sm:$0xf] %vm699_vm2, %v2320_v14  ;;  %v570_v20 = vmax.f32 %v536_v15, 0.0  ;;  %v528_v21 = vadd.f32 %v3094_v52, %v527_v17  ;;  %v893_v22 = vadd.f32 %v3099_v53, %v892_v18 }
 0x122   : > { %v2323_v23 = vpack.c.bf16 %v901_v16, %v901_v16 }
 0x123   : > { %728 = vst.msk [vmem:[#allocation2 + $0x70] sm:$0xf] %vm699_vm2, %v2288_v19  ;;  %v2291_v24 = vpack.c.bf16 %v570_v20, %v570_v20  ;;  %v568_v25 = vmax.f32 %v528_v21, 0.0  ;;  %v2321_v26 = vpack.c.bf16 %v893_v22, %v893_v22 }
 0x124   : > { %1063 = vst.msk [vmem:[#allocation3 + $0x7c] sm:$0xf] %vm699_vm2, %v2323_v23 }
 0x125   : > { %731 = vst.msk [vmem:[#allocation2 + $0x7c] sm:$0xf] %vm699_vm2, %v2291_v24  ;;  %v2289_v27 = vpack.c.bf16 %v568_v25, %v568_v25  ;;  %1061 = vst.msk [vmem:[#allocation3 + $0x74] sm:$0xf] %vm699_vm2, %v2321_v26 }
 0x127   : > { %729 = vst.msk [vmem:[#allocation2 + $0x74] sm:$0xf] %vm699_vm2, %v2289_v27 }
 0x128 PF: > { %vm1237_vm3 = vcmask 261120   ;;  %v2675_v52 = vld [vmem:[#allocation2 + $0x38] sm:$0xff]   ;;  %s2209_s30 = sshll.u32 %s2880_s24, 7  ;;  %v2677_v30 = vld [vmem:[#allocation2 + $0x30] sm:$0xff]   ;;  %v2678_v32 = vld [vmem:[#allocation2 + $0x68] sm:$0xff]   ;;  %vm2899_vm4 = vmmov 0  }
 0x129   : > { %v1284_v29 = vsel %vm1237_vm3, %v2675_v52, 0  ;;  %s1065_s13 = sshra.s32 %s2209_s30, 3  ;;  %v1281_v31 = vsel %vm1237_vm3, %v2677_v30, 0  ;;  %v2679_v33 = vld [vmem:[#allocation2 + $0x28] sm:$0xff]   ;;  %v2680_v36 = vld [vmem:[#allocation2 + $0x60] sm:$0xff]   ;;  %v2683_v43 = vld [vmem:[#allocation2 + $0x18] sm:$0xff]  }
 0x12a   : > { %s2210_s14 = sshll.u32 %s1065_s13, 2  ;;  %v1278_v35 = vsel %vm1237_vm3, %v2679_v33, 0  ;;  %v2681_v41 = vld [vmem:[#allocation2 + $0x20] sm:$0xff]   ;;  %v2682_v45 = vld [vmem:[#allocation2 + $0x58] sm:$0xff]   ;;  %v1272_v46 = vsel %vm1237_vm3, %v2683_v43, 0  ;;  %v2684_v47 = vld [vmem:[#allocation2 + $0x50] sm:$0xff]  }
 0x12b   : > { %s3235_s18 = scalar_lea.vmem [#allocation2], %s2210_s14  ;;  %v1275_v44 = vsel %vm1237_vm3, %v2681_v41, 0  ;;  %v2685_v48 = vld [vmem:[#allocation2 + $0x10] sm:$0xff]   ;;  %v2686_v50 = vld [vmem:[#allocation2 + $0x48] sm:$0xff]   ;;  %v2688_v55 = vld [vmem:[#allocation2 + $0x40] sm:$0xff]   ;;  %s2255_s30 = sshll.u32 %s2884_s25, 1 }
 0x12c   : > { %v2674_v28 = vld [vmem:[#allocation2 + $0x78] sm:$0xff]   ;;  %v1269_v49 = vsel %vm1237_vm3, %v2685_v48, 0  ;;  %v2687_v51 = vld [vmem:[#allocation2 + $0x8] sm:$0xff]   ;;  %v2689_v56 = vld [vmem:[#allocation2] sm:$0xff]   ;;  %s2024_s13 = sadd.s32 %s2880_s24, %s2255_s30  ;;  %s2013_s25 = scalar_lea.sflag [#allocation5], %s256_s16 }
 0x12d   : > { %2592 = vmatprep.subr.msk.bf16.mxu0 %vm1237_vm3, %v2674_v28  ;;  %v1266_v54 = vsel %vm1237_vm3, %v2687_v51, 0  ;;  %v1263_v60 = vsel %vm1237_vm3, %v2689_v56, 0  ;;  %s2256_s14 = sshll.u32 %s2024_s13, 6  ;;  %s2900_s12 = smov [#allocation4]  }
 0x12e   : > { %v2676_v53 = vld [vmem:[#allocation2 + $0x70] sm:$0xff]   ;;  %2398 = vmatpush3.bf16.xpose.msra.mxu0 %v1284_v29  ;;  %v2325_v34 = vld [vmem:[%s3235_s18] sm:$0xff]   ;;  %v2356_v57 = vld [vmem:[%s3235_s18 + $0x8] sm:$0xff]   ;;  %s3574_s29 = scalar_lea.hbm %s3636_s6, %s2256_s14  ;;  %s2808_s30 = sshll.u32 %s2900_s12, 4  ;;  %s2809_s30 = int_to_ptr.vmem [resolvable:$false] %s2808_s30 }
 0x12f   : > { %2593 = vmatprep.subr.msk.bf16.mxu0 %vm1237_vm3, %v2676_v53  ;;  %v2326_v37 = vunpack.c.l.bf16 %v2325_v34  ;;  %v2327_v38 = vunpack.c.h.bf16 %v2325_v34  ;;  %v2330_v58 = vunpack.c.l.bf16 %v2356_v57  ;;  %v2331_v59 = vunpack.c.h.bf16 %v2356_v57  ;;  %v2357_v63 = vld [vmem:[%s3235_s18 + $0x10] sm:$0xff]   ;;  %v2358_v5 = vld [vmem:[%s3235_s18 + $0x18] sm:$0xff]   ;;  %v2359_v11 = vld [vmem:[%s3235_s18 + $0x20] sm:$0xff]   ;;  %s2810_s13 = scalar_lea.vmem %s2809_s30, 128 }
 0x130   : > { %v2334_v1 = vunpack.c.l.bf16 %v2357_v63  ;;  %v2335_v2 = vunpack.c.h.bf16 %v2357_v63  ;;  %v2338_v7 = vunpack.c.l.bf16 %v2358_v5  ;;  %v2339_v8 = vunpack.c.h.bf16 %v2358_v5  ;;  %v2360_v17 = vld [vmem:[%s3235_s18 + $0x28] sm:$0xff]   ;;  %v2361_v23 = vld [vmem:[%s3235_s18 + $0x30] sm:$0xff]   ;;  %v2362_v52 = vld [vmem:[%s3235_s18 + $0x38] sm:$0xff]   ;;  %s2028_s18 = sshll.u32 %s258_s9, 4  ;;  %s3576_s18 = int_to_ptr.vmem [resolvable:$true] %s2028_s18 }
 0x131   : > { %v1101_v39 = vmul.f32 0.17677669, %v2326_v37  ;;  %v1102_v40 = vmul.f32 0.17677669, %v2327_v38  ;;  %v1103_v61 = vmul.f32 0.17677669, %v2330_v58  ;;  %v2342_v13 = vunpack.c.l.bf16 %v2359_v11  ;;  %p2811_p4 = scmp.lt.s32.totalorder %s3576_s18, %s2809_s30 }
 0x132   : > { %v1104_v62 = vmul.f32 0.17677669, %v2331_v59  ;;  %v1105_v3 = vmul.f32 0.17677669, %v2334_v1  ;;  %v1106_v4 = vmul.f32 0.17677669, %v2335_v2  ;;  %v2343_v14 = vunpack.c.h.bf16 %v2359_v11 }
 0x133   : > { %v1117_v42 = vpack.c.bf16 %v1102_v40, %v1101_v39  ;;  %v1107_v9 = vmul.f32 0.17677669, %v2338_v7  ;;  %v1108_v10 = vmul.f32 0.17677669, %v2339_v8  ;;  %v1109_v15 = vmul.f32 0.17677669, %v2342_v13 }
 0x134   : > { %v1118_v0 = vpack.c.bf16 %v1104_v62, %v1103_v61  ;;  %v1119_v6 = vpack.c.bf16 %v1106_v4, %v1105_v3  ;;  %v1110_v16 = vmul.f32 0.17677669, %v2343_v14  ;;  %v2346_v19 = vunpack.c.l.bf16 %v2360_v17  ;;  %s2804_s24 = scalar_lea.vmem %s3576_s18, 64 }
 0x135   : > { %2413 = vmatprep.mubr.msk.bf16.mxu0 %vm1237_vm3, %v1117_v42  ;;  %v1120_v12 = vpack.c.bf16 %v1108_v10, %v1107_v9  ;;  %v2347_v20 = vunpack.c.h.bf16 %v2360_v17  ;;  %v2350_v25 = vunpack.c.l.bf16 %v2361_v23  ;;  %v2351_v26 = vunpack.c.h.bf16 %v2361_v23  ;;  %v2693_v23 = vld [vmem:[#allocation3 + $0x30] sm:$0xff]   ;;  %p2805_p0 = scmp.ne.s32.totalorder %s3576_s18, %s2804_s24  ;;  %p2812_p5 = scmp.lt.s32.totalorder %s2810_s13, %s2804_s24 }
 0x136   : > { %2400 = vmatpush3.bf16.xpose.msra.mxu0 %v1281_v31  ;;  %v1121_v18 = vpack.c.bf16 %v1110_v16, %v1109_v15  ;;  %v1111_v21 = vmul.f32 0.17677669, %v2346_v19  ;;  %v2354_v29 = vunpack.c.l.bf16 %v2362_v52  ;;  %v2355_v30 = vunpack.c.h.bf16 %v2362_v52 }
 0x137   : > { %2594 = vmatprep.subr.msk.bf16.mxu0 %vm1237_vm3, %v2678_v32  ;;  %v1112_v22 = vmul.f32 0.17677669, %v2347_v20  ;;  %v1113_v27 = vmul.f32 0.17677669, %v2350_v25  ;;  %v1114_v28 = vmul.f32 0.17677669, %v2351_v26  ;;  %p2806_p1 = pnand %p2805_p0, %p2987_p3  ;;  %p2813_p6 = por %p2812_p5, %p2811_p4 }
 0x138   : > { %v1115_v31 = vmul.f32 0.17677669, %v2354_v29  ;;  %v1116_v32 = vmul.f32 0.17677669, %v2355_v30  ;;  %v2690_v20 = vld [vmem:[#allocation3 + $0x78] sm:$0xff]  }
 0x139   : > { %v1122_v24 = vpack.c.bf16 %v1112_v22, %v1111_v21  ;;  %v1123_v53 = vpack.c.bf16 %v1114_v28, %v1113_v27  ;;  %v2691_v21 = vld [vmem:[#allocation3 + $0x38] sm:$0xff]   ;;  %v2692_v22 = vld [vmem:[#allocation3 + $0x70] sm:$0xff]   ;;  %2429 = vmatprep.subr.bf16.mxu1 %v2690_v20  ;;  %p2807_p2 = pneg %p2806_p1 }
 0x13a   : > { %v1124_v33 = vpack.c.bf16 %v1116_v32, %v1115_v31  ;;  %2430 = vmatpush3.bf16.msra.mxu1 %v2691_v21 }
 0x13b   : > { %2431 = vmatprep.subr.bf16.mxu1 %v2692_v22  ;;  %p2814_p7 = pnand %p2813_p6, %p2807_p2 }
 0x13e   : > { %2402 = vmatpush3.bf16.xpose.msra.mxu0 %v1278_v35  ;;  %2432 = vmatpush3.bf16.msra.mxu1 %v2693_v23 }
 0x13f   : > { %2595 = vmatprep.subr.msk.bf16.mxu0 %vm1237_vm3, %v2680_v36 }
 0x146   : > { %2404 = vmatpush3.bf16.xpose.msra.mxu0 %v1275_v44 }
 0x147   : > { %2596 = vmatprep.subr.msk.bf16.mxu0 %vm1237_vm3, %v2682_v45 }
 0x14e   : > { %2406 = vmatpush3.bf16.xpose.msra.mxu0 %v1272_v46 }
 0x14f   : > { %2597 = vmatprep.subr.msk.bf16.mxu0 %vm1237_vm3, %v2684_v47 }
 0x156   : > { %2408 = vmatpush3.bf16.xpose.msra.mxu0 %v1269_v49 }
 0x157   : > { %2598 = vmatprep.subr.msk.bf16.mxu0 %vm1237_vm3, %v2686_v50 }
 0x15e   : > { %2410 = vmatpush3.bf16.xpose.msra.mxu0 %v1266_v54 }
 0x15f   : > { %2599 = vmatprep.subr.msk.bf16.mxu0 %vm1237_vm3, %v2688_v55 }
 0x166   : > { %2412 = vmatpush3.bf16.xpose.msra.mxu0 %v1263_v60 }
 0x16d   : > { %2414 = vmatmul.mubr.msk.bf16.vlgmr.msra.gmra.mxu0 %vm1237_vm3, %v1117_v42 }
 0x16e   : > { %2415 = vmatprep.mubr.msk.bf16.mxu0 %vm1237_vm3, %v1118_v0 }
 0x175   : > { %2416 = vmatmul.mubr.msk.bf16.gmra.mxu0 %vm1237_vm3, %v1118_v0 }
 0x176   : > { %2417 = vmatprep.mubr.msk.bf16.mxu0 %vm1237_vm3, %v1119_v6 }
 0x17d   : > { %2418 = vmatmul.mubr.msk.bf16.gmra.mxu0 %vm1237_vm3, %v1119_v6 }
 0x17e   : > { %2419 = vmatprep.mubr.msk.bf16.mxu0 %vm1237_vm3, %v1120_v12 }
 0x185   : > { %2420 = vmatmul.mubr.msk.bf16.gmra.mxu0 %vm1237_vm3, %v1120_v12 }
 0x186   : > { %2421 = vmatprep.mubr.msk.bf16.mxu0 %vm1237_vm3, %v1121_v18 }
 0x18d   : > { %2422 = vmatmul.mubr.msk.bf16.gmra.mxu0 %vm1237_vm3, %v1121_v18 }
 0x18e   : > { %2423 = vmatprep.mubr.msk.bf16.mxu0 %vm1237_vm3, %v1122_v24 }
 0x195   : > { %2424 = vmatmul.mubr.msk.bf16.gmra.mxu0 %vm1237_vm3, %v1122_v24  ;;  %v2694_v24 = vld [vmem:[#allocation3 + $0x68] sm:$0xff]  }
 0x196   : > { %2425 = vmatprep.mubr.msk.bf16.mxu0 %vm1237_vm3, %v1123_v53  ;;  %2433 = vmatprep.subr.bf16.mxu1 %v2694_v24 }
 0x19d   : > { %2426 = vmatmul.mubr.msk.bf16.gmra.mxu0 %vm1237_vm3, %v1123_v53 }
 0x19e   : > { %2427 = vmatprep.mubr.msk.bf16.mxu0 %vm1237_vm3, %v1124_v33 }
 0x1a5   : > { %2428 = vmatmul.mubr.msk.bf16.gmra.mxu0 %vm1237_vm3, %v1124_v33 }
 0x22d   : > { %v3272_v34 = vpop.f32.mrf.mxu0 }
 0x22f   : > { %v3274_v35 = vpop.f32.mrf.mxu0 }
 0x230   : > { %v1423_v36 = vmax.f32 %v3272_v34, %v3274_v35 }
 0x231   : > { %v3278_v37 = vpop.f32.mrf.mxu0 }
 0x232   : > { %1424 = vmax.xlane.f32.xlu0 %v1423_v36 }
 0x233   : > { %v3280_v38 = vpop.f32.mrf.mxu0 }
 0x234   : > { %v1426_v39 = vmax.f32 %v3278_v37, %v3280_v38 }
 0x235   : > { %v3284_v40 = vpop.f32.mrf.mxu0 }
 0x236   : > { %1427 = vmax.xlane.f32.xlu0 %v1426_v39 }
 0x237   : > { %v3286_v41 = vpop.f32.mrf.mxu0 }
 0x238   : > { %v1429_v42 = vmax.f32 %v3284_v40, %v3286_v41 }
 0x239   : > { %v3290_v43 = vpop.f32.mrf.mxu0 }
 0x23a   : > { %1430 = vmax.xlane.f32.xlu1 %v1429_v42 }
 0x23b   : > { %v3292_v44 = vpop.f32.mrf.mxu0 }
 0x23c   : > { %v1432_v45 = vmax.f32 %v3290_v43, %v3292_v44 }
 0x23d   : > { %v3296_v46 = vpop.f32.mrf.mxu0 }
 0x23e   : > { %1433 = vmax.xlane.f32.xlu1 %v1432_v45 }
 0x23f   : > { %v3298_v47 = vpop.f32.mrf.mxu0 }
 0x240   : > { %v1435_v48 = vmax.f32 %v3296_v46, %v3298_v47 }
 0x241   : > { %v3302_v49 = vpop.f32.mrf.mxu0 }
 0x242   : > { %1436 = vmax.xlane.f32.xlu0 %v1435_v48 }
 0x243   : > { %v3304_v50 = vpop.f32.mrf.mxu0 }
 0x244   : > { %v1438_v51 = vmax.f32 %v3302_v49, %v3304_v50 }
 0x245   : > { %v3308_v54 = vpop.f32.mrf.mxu0 }
 0x246   : > { %1439 = vmax.xlane.f32.xlu1 %v1438_v51 }
 0x247   : > { %v3310_v55 = vpop.f32.mrf.mxu0 }
 0x248   : > { %v1441_v56 = vmax.f32 %v3308_v54, %v3310_v55 }
 0x249   : > { %v3314_v57 = vpop.f32.mrf.mxu0 }
 0x24a   : > { %1442 = vmax.xlane.f32.xlu0 %v1441_v56 }
 0x24b   : > { %v3316_v58 = vpop.f32.mrf.mxu0 }
 0x24c   : > { %v1444_v59 = vmax.f32 %v3314_v57, %v3316_v58 }
 0x24d   : > { %v3320_v60 = vpop.f32.mrf.mxu0 }
 0x24e   : > { %1445 = vmax.xlane.f32.xlu1 %v1444_v59 }
 0x24f   : > { %v3322_v61 = vpop.f32.mrf.mxu0 }
 0x250   : > { %v1447_v62 = vmax.f32 %v3320_v60, %v3322_v61 }
 0x251   : > { %v3326_v63 = vpop.f32.mrf.mxu0 }
 0x252   : > { %1448 = vmax.xlane.f32.xlu0 %v1447_v62 }
 0x253   : > { %v3328_v0 = vpop.f32.mrf.mxu0 }
 0x254   : > { %v1450_v1 = vmax.f32 %v3326_v63, %v3328_v0 }
 0x255   : > { %v3332_v2 = vpop.f32.mrf.mxu0 }
 0x256   : > { %1451 = vmax.xlane.f32.xlu1 %v1450_v1 }
 0x257   : > { %v3334_v3 = vpop.f32.mrf.mxu0 }
 0x258   : > { %v1453_v4 = vmax.f32 %v3332_v2, %v3334_v3 }
 0x259   : > { %v3338_v5 = vpop.f32.mrf.mxu0 }
 0x25a   : > { %1454 = vmax.xlane.f32.xlu0 %v1453_v4 }
 0x25b   : > { %v3340_v6 = vpop.f32.mrf.mxu0 }
 0x25c   : > { %v1456_v7 = vmax.f32 %v3338_v5, %v3340_v6 }
 0x25d   : > { %v3344_v8 = vpop.f32.mrf.mxu0 }
 0x25e   : > { %1457 = vmax.xlane.f32.xlu1 %v1456_v7 }
 0x25f   : > { %v3346_v9 = vpop.f32.mrf.mxu0 }
 0x260   : > { %v1459_v10 = vmax.f32 %v3344_v8, %v3346_v9 }
 0x261   : > { %v3350_v11 = vpop.f32.mrf.mxu0 }
 0x262   : > { %1460 = vmax.xlane.f32.xlu0 %v1459_v10 }
 0x263   : > { %v3352_v12 = vpop.f32.mrf.mxu0 }
 0x264   : > { %v1462_v13 = vmax.f32 %v3350_v11, %v3352_v12 }
 0x265   : > { %v3356_v14 = vpop.f32.mrf.mxu0 }
 0x266   : > { %1463 = vmax.xlane.f32.xlu1 %v1462_v13 }
 0x267   : > { %v3358_v15 = vpop.f32.mrf.mxu0 }
 0x268   : > { %v1465_v16 = vmax.f32 %v3356_v14, %v3358_v15 }
 0x269   : > { %v3362_v17 = vpop.f32.mrf.mxu0 }
 0x26a   : > { %1466 = vmax.xlane.f32.xlu0 %v1465_v16 }
 0x26b   : > { %v3364_v18 = vpop.f32.mrf.mxu0 }
 0x26c   : > { %v1468_v19 = vmax.f32 %v3362_v17, %v3364_v18 }
 0x26e   : > { %1469 = vmax.xlane.f32.xlu1 %v1468_v19 }
 0x2bb   : > { %v1425_v25 = vpop.xlane.xlu0 %1424 }
 0x2bc   : > { %v1471_v26 = vsub.f32 %v3272_v34, %v1425_v25  ;;  %v1472_v27 = vsub.f32 %v3274_v35, %v1425_v25 }
 0x2be   : > { %v1503_v28 = vmul.f32 1.442695, %v1471_v26  ;;  %v1505_v52 = vmul.f32 1.442695, %v1472_v27 }
 0x2bf   : > { %v1428_v53 = vpop.xlane.xlu0 %1427 }
 0x2c0   : > { %2708 = vpow2.f32 %v1503_v28  ;;  %v1473_v29 = vsub.f32 %v3278_v37, %v1428_v53  ;;  %v1474_v30 = vsub.f32 %v3280_v38, %v1428_v53 }
 0x2c1   : > { %2710 = vpow2.f32 %v1505_v52 }
 0x2c2   : > { %v1507_v31 = vmul.f32 1.442695, %v1473_v29  ;;  %v1509_v32 = vmul.f32 1.442695, %v1474_v30 }
 0x2c3   : > { %v1431_v33 = vpop.xlane.xlu1 %1430 }
 0x2c4   : > { %2712 = vpow2.f32 %v1507_v31  ;;  %v1475_v36 = vsub.f32 %v3284_v40, %v1431_v33  ;;  %v1476_v39 = vsub.f32 %v3286_v41, %v1431_v33  ;;  %v2696_v31 = vld [vmem:[#allocation3 + $0x60] sm:$0xff]  }
 0x2c5   : > { %2714 = vpow2.f32 %v1509_v32  ;;  %v2697_v33 = vld [vmem:[#allocation3 + $0x20] sm:$0xff]  }
 0x2c6   : > { %v1511_v34 = vmul.f32 1.442695, %v1475_v36  ;;  %v1513_v35 = vmul.f32 1.442695, %v1476_v39 }
 0x2c7   : > { %v1434_v42 = vpop.xlane.xlu1 %1433 }
 0x2c8   : > { %2716 = vpow2.f32 %v1511_v34  ;;  %v1477_v45 = vsub.f32 %v3290_v43, %v1434_v42  ;;  %v1478_v37 = vsub.f32 %v3292_v44, %v1434_v42 }
 0x2c9   : > { %2718 = vpow2.f32 %v1513_v35 }
 0x2ca   : > { %v1515_v38 = vmul.f32 1.442695, %v1477_v45  ;;  %v1517_v48 = vmul.f32 1.442695, %v1478_v37  ;;  %v2698_v45 = vld [vmem:[#allocation3 + $0x58] sm:$0xff]  }
 0x2cb   : > { %v1437_v51 = vpop.xlane.xlu0 %1436 }
 0x2cc   : > { %2720 = vpow2.f32 %v1515_v38  ;;  %v1479_v56 = vsub.f32 %v3296_v46, %v1437_v51  ;;  %v1480_v40 = vsub.f32 %v3298_v47, %v1437_v51  ;;  %v2699_v38 = vld [vmem:[#allocation3 + $0x18] sm:$0xff]  }
 0x2cd   : > { %v3378_v59 = vpop.eup %2708  ;;  %2722 = vpow2.f32 %v1517_v48 }
 0x2ce   : > { %v3380_v41 = vpop.eup %2710  ;;  %v1519_v62 = vmul.f32 1.442695, %v1479_v56  ;;  %v1521_v1 = vmul.f32 1.442695, %v1480_v40 }
 0x2cf   : > { %v1440_v4 = vpop.xlane.xlu1 %1439  ;;  %v1567_v43 = vadd.f32 %v3380_v41, %v3378_v59 }
 0x2d0   : > { %2724 = vpow2.f32 %v1519_v62  ;;  %v1481_v44 = vsub.f32 %v3302_v49, %v1440_v4  ;;  %v1482_v7 = vsub.f32 %v3304_v50, %v1440_v4 }
 0x2d1   : > { %v3386_v10 = vpop.eup %2712  ;;  %2726 = vpow2.f32 %v1521_v1  ;;  %1568 = vadd.xlane.f32.xlu0 %v1567_v43  ;;  %v2700_v1 = vld [vmem:[#allocation3 + $0x50] sm:$0xff]  }
 0x2d2   : > { %v3388_v46 = vpop.eup %2714  ;;  %v1523_v47 = vmul.f32 1.442695, %v1481_v44  ;;  %v1525_v13 = vmul.f32 1.442695, %v1482_v7  ;;  %v2701_v43 = vld [vmem:[#allocation3 + $0x10] sm:$0xff]  }
 0x2d3   : > { %v1443_v16 = vpop.xlane.xlu0 %1442  ;;  %v1570_v19 = vadd.f32 %v3388_v46, %v3386_v10 }
 0x2d4   : > { %2728 = vpow2.f32 %v1523_v47  ;;  %v1483_v20 = vsub.f32 %v3308_v54, %v1443_v16  ;;  %v1484_v21 = vsub.f32 %v3310_v55, %v1443_v16  ;;  %v2695_v55 = vld [vmem:[#allocation3 + $0x28] sm:$0xff]  }
 0x2d5   : > { %v3394_v49 = vpop.eup %2716  ;;  %2730 = vpow2.f32 %v1525_v13  ;;  %1571 = vadd.xlane.f32.xlu1 %v1570_v19  ;;  %2434 = vmatpush3.bf16.msra.mxu1 %v2695_v55  ;;  %v2702_v19 = vld [vmem:[#allocation3 + $0x48] sm:$0xff]  }
 0x2d6   : > { %v3396_v50 = vpop.eup %2718  ;;  %v1527_v22 = vmul.f32 1.442695, %v1483_v20  ;;  %v1529_v23 = vmul.f32 1.442695, %v1484_v21  ;;  %2435 = vmatprep.subr.bf16.mxu1 %v2696_v31  ;;  %v2703_v21 = vld [vmem:[#allocation3 + $0x8] sm:$0xff]  }
 0x2d7   : > { %v1446_v24 = vpop.xlane.xlu1 %1445  ;;  %v1573_v25 = vadd.f32 %v3396_v50, %v3394_v49 }
 0x2d8   : > { %2732 = vpow2.f32 %v1527_v22  ;;  %v1485_v26 = vsub.f32 %v3314_v57, %v1446_v24  ;;  %v1486_v27 = vsub.f32 %v3316_v58, %v1446_v24 }
 0x2d9   : > { %v3402_v54 = vpop.eup %2720  ;;  %2734 = vpow2.f32 %v1529_v23  ;;  %1574 = vadd.xlane.f32.xlu0 %v1573_v25  ;;  %2436 = vmatpush3.bf16.msra.mxu1 %v2697_v33 }
 0x2da   : > { %v3404_v28 = vpop.eup %2722  ;;  %v1531_v52 = vmul.f32 1.442695, %v1485_v26  ;;  %v1533_v53 = vmul.f32 1.442695, %v1486_v27  ;;  %2437 = vmatprep.subr.bf16.mxu1 %v2698_v45  ;;  %v2704_v27 = vld [vmem:[#allocation3 + $0x40] sm:$0xff]  }
 0x2db   : > { %v1449_v29 = vpop.xlane.xlu0 %1448  ;;  %v1576_v30 = vadd.f32 %v3404_v28, %v3402_v54 }
 0x2dc   : > { %2736 = vpow2.f32 %v1531_v52  ;;  %v1487_v57 = vsub.f32 %v3320_v60, %v1449_v29  ;;  %v1488_v58 = vsub.f32 %v3322_v61, %v1449_v29  ;;  %v2705_v52 = vld [vmem:[#allocation3] sm:$0xff]  }
 0x2dd   : > { %v3410_v32 = vpop.eup %2724  ;;  %2738 = vpow2.f32 %v1533_v53  ;;  %1577 = vadd.xlane.f32.xlu1 %v1576_v30  ;;  %2438 = vmatpush3.bf16.msra.mxu1 %v2699_v38 }
 0x2de   : > { %v3412_v36 = vpop.eup %2726  ;;  %v1535_v39 = vmul.f32 1.442695, %v1487_v57  ;;  %v1537_v34 = vmul.f32 1.442695, %v1488_v58  ;;  %2439 = vmatprep.subr.bf16.mxu1 %v2700_v1 }
 0x2df   : > { %v1452_v35 = vpop.xlane.xlu1 %1451  ;;  %v1579_v42 = vadd.f32 %v3412_v36, %v3410_v32 }
 0x2e0   : > { %2740 = vpow2.f32 %v1535_v39  ;;  %v1489_v60 = vsub.f32 %v3326_v63, %v1452_v35  ;;  %v1490_v61 = vsub.f32 %v3328_v0, %v1452_v35 }
 0x2e1   : > { %v3418_v37 = vpop.eup %2728  ;;  %2742 = vpow2.f32 %v1537_v34  ;;  %1580 = vadd.xlane.f32.xlu0 %v1579_v42  ;;  %2440 = vmatpush3.bf16.msra.mxu1 %v2701_v43 }
 0x2e2   : > { %v3420_v48 = vpop.eup %2730  ;;  %v1539_v51 = vmul.f32 1.442695, %v1489_v60  ;;  %v1541_v56 = vmul.f32 1.442695, %v1490_v61  ;;  %2441 = vmatprep.subr.bf16.mxu1 %v2702_v19 }
 0x2e3   : > { %v1455_v40 = vpop.xlane.xlu0 %1454  ;;  %v1582_v62 = vadd.f32 %v3420_v48, %v3418_v37 }
 0x2e4   : > { %2744 = vpow2.f32 %v1539_v51  ;;  %v1491_v63 = vsub.f32 %v3332_v2, %v1455_v40  ;;  %v1492_v0 = vsub.f32 %v3334_v3, %v1455_v40 }
 0x2e5   : > { %v3426_v4 = vpop.eup %2732  ;;  %2746 = vpow2.f32 %v1541_v56  ;;  %1583 = vadd.xlane.f32.xlu1 %v1582_v62  ;;  %2442 = vmatpush3.bf16.msra.mxu1 %v2703_v21 }
 0x2e6   : > { %v3428_v44 = vpop.eup %2734  ;;  %v1543_v7 = vmul.f32 1.442695, %v1491_v63  ;;  %v1545_v47 = vmul.f32 1.442695, %v1492_v0  ;;  %2443 = vmatprep.subr.bf16.mxu1 %v2704_v27 }
 0x2e7   : > { %v1458_v13 = vpop.xlane.xlu1 %1457  ;;  %v1585_v16 = vadd.f32 %v3428_v44, %v3426_v4 }
 0x2e8   : > { %2748 = vpow2.f32 %v1543_v7  ;;  %v1493_v2 = vsub.f32 %v3338_v5, %v1458_v13  ;;  %v1494_v3 = vsub.f32 %v3340_v6, %v1458_v13 }
 0x2e9   : > { %v3434_v20 = vpop.eup %2736  ;;  %2750 = vpow2.f32 %v1545_v47  ;;  %1586 = vadd.xlane.f32.xlu0 %v1585_v16  ;;  %2444 = vmatpush3.bf16.msra.mxu1 %v2705_v52 }
 0x2ea   : > { %v3436_v22 = vpop.eup %2738  ;;  %v1547_v23 = vmul.f32 1.442695, %v1493_v2  ;;  %v1549_v24 = vmul.f32 1.442695, %v1494_v3 }
 0x2eb   : > { %v1461_v25 = vpop.xlane.xlu0 %1460  ;;  %v1588_v26 = vadd.f32 %v3436_v22, %v3434_v20 }
 0x2ec   : > { %2752 = vpow2.f32 %v1547_v23  ;;  %v1495_v5 = vsub.f32 %v3344_v8, %v1461_v25  ;;  %v1496_v6 = vsub.f32 %v3346_v9, %v1461_v25 }
 0x2ed   : > { %v3442_v55 = vpop.eup %2740  ;;  %2754 = vpow2.f32 %v1549_v24  ;;  %1589 = vadd.xlane.f32.xlu1 %v1588_v26 }
 0x2ee   : > { %v3444_v53 = vpop.eup %2742  ;;  %v1551_v29 = vmul.f32 1.442695, %v1495_v5  ;;  %v1553_v30 = vmul.f32 1.442695, %v1496_v6 }
 0x2ef   : > { %v1464_v31 = vpop.xlane.xlu1 %1463  ;;  %v1591_v57 = vadd.f32 %v3444_v53, %v3442_v55 }
 0x2f0   : > { %2756 = vpow2.f32 %v1551_v29  ;;  %v1497_v8 = vsub.f32 %v3350_v11, %v1464_v31  ;;  %v1498_v9 = vsub.f32 %v3352_v12, %v1464_v31 }
 0x2f1   : > { %v3450_v58 = vpop.eup %2744  ;;  %2758 = vpow2.f32 %v1553_v30  ;;  %1592 = vadd.xlane.f32.xlu0 %v1591_v57 }
 0x2f2   : > { %v3452_v33 = vpop.eup %2746  ;;  %v1555_v39 = vmul.f32 1.442695, %v1497_v8  ;;  %v1557_v34 = vmul.f32 1.442695, %v1498_v9 }
 0x2f3   : > { %v1467_v35 = vpop.xlane.xlu0 %1466  ;;  %v1594_v42 = vadd.f32 %v3452_v33, %v3450_v58 }
 0x2f4   : > { %2760 = vpow2.f32 %v1555_v39  ;;  %v1499_v45 = vsub.f32 %v3356_v14, %v1467_v35  ;;  %v1500_v60 = vsub.f32 %v3358_v15, %v1467_v35 }
 0x2f5   : > { %v3458_v11 = vpop.eup %2748  ;;  %2762 = vpow2.f32 %v1557_v34  ;;  %1595 = vadd.xlane.f32.xlu1 %v1594_v42 }
 0x2f6   : > { %v3460_v12 = vpop.eup %2750  ;;  %v1559_v61 = vmul.f32 1.442695, %v1499_v45  ;;  %v1561_v38 = vmul.f32 1.442695, %v1500_v60 }
 0x2f7   : > { %v1470_v51 = vpop.xlane.xlu1 %1469  ;;  %v1597_v56 = vadd.f32 %v3460_v12, %v3458_v11 }
 0x2f8   : > { %2764 = vpow2.f32 %v1559_v61  ;;  %v1501_v40 = vsub.f32 %v3362_v17, %v1470_v51  ;;  %v1502_v62 = vsub.f32 %v3364_v18, %v1470_v51 }
 0x2f9   : > { %v3466_v14 = vpop.eup %2752  ;;  %2766 = vpow2.f32 %v1561_v38  ;;  %1598 = vadd.xlane.f32.xlu0 %v1597_v56 }
 0x2fa   : > { %v3468_v15 = vpop.eup %2754  ;;  %v1563_v1 = vmul.f32 1.442695, %v1501_v40  ;;  %v1565_v63 = vmul.f32 1.442695, %v1502_v62 }
 0x2fb   : > { %v1600_v0 = vadd.f32 %v3468_v15, %v3466_v14 }
 0x2fc   : > { %2768 = vpow2.f32 %v1563_v1 }
 0x2fd   : > { %v3472_v43 = vpop.eup %2756  ;;  %2770 = vpow2.f32 %v1565_v63  ;;  %1601 = vadd.xlane.f32.xlu1 %v1600_v0 }
 0x2fe   : > { %v3474_v7 = vpop.eup %2758 }
 0x2ff   : > { %v1603_v17 = vadd.f32 %v3474_v7, %v3472_v43 }
 0x301   : > { %v3478_v18 = vpop.eup %2760  ;;  %1604 = vadd.xlane.f32.xlu0 %v1603_v17 }
 0x302   : > { %v3480_v47 = vpop.eup %2762 }
 0x303   : > { %v1606_v13 = vadd.f32 %v3480_v47, %v3478_v18 }
 0x305   : > { %v3484_v16 = vpop.eup %2764  ;;  %1607 = vadd.xlane.f32.xlu1 %v1606_v13 }
 0x306   : > { %v3486_v19 = vpop.eup %2766 }
 0x307   : > { %v1609_v2 = vadd.f32 %v3486_v19, %v3484_v16 }
 0x309   : > { %v3490_v3 = vpop.eup %2768  ;;  %1610 = vadd.xlane.f32.xlu0 %v1609_v2 }
 0x30a   : > { %v3492_v21 = vpop.eup %2770 }
 0x30b   : > { %v1612_v23 = vadd.f32 %v3492_v21, %v3490_v3 }
 0x30d   : > { %1613 = vadd.xlane.f32.xlu1 %v1612_v23 }
 0x35a   : > { %v1569_v24 = vpop.xlane.xlu0 %1568 }
 0x35b   : > { %2772 = vrcp.f32 %v1569_v24 }
 0x35e   : > { %v1572_v25 = vpop.xlane.xlu1 %1571 }
 0x35f   : > { %2774 = vrcp.f32 %v1572_v25 }
 0x362   : > { %v1575_v26 = vpop.xlane.xlu0 %1574 }
 0x363   : > { %2776 = vrcp.f32 %v1575_v26 }
 0x366   : > { %v1578_v27 = vpop.xlane.xlu1 %1577 }
 0x367   : > { %2778 = vrcp.f32 %v1578_v27 }
 0x368   : > { %v2773_v5 = vpop.eup %2772 }
 0x369   : > { %v1632_v29 = vmul.f32 %v2773_v5, %v3380_v41  ;;  %v1631_v31 = vmul.f32 %v2773_v5, %v3378_v59 }
 0x36a   : > { %v1581_v6 = vpop.xlane.xlu0 %1580 }
 0x36b   : > { %2780 = vrcp.f32 %v1581_v6 }
 0x36c   : > { %v2775_v52 = vpop.eup %2774 }
 0x36d   : > { %v1634_v30 = vmul.f32 %v2775_v52, %v3388_v46  ;;  %v1633_v57 = vmul.f32 %v2775_v52, %v3386_v10 }
 0x36e   : > { %v1584_v8 = vpop.xlane.xlu1 %1583 }
 0x36f   : > { %2782 = vrcp.f32 %v1584_v8  ;;  %v1664_v9 = vpack.c.bf16 %v1634_v30, %v1632_v29  ;;  %v1663_v39 = vpack.c.bf16 %v1633_v57, %v1631_v31 }
 0x370   : > { %v2777_v34 = vpop.eup %2776 }
 0x371   : > { %1839 = vmatprep.mubr.bf16.mxu1 %v1664_v9  ;;  %v1636_v45 = vmul.f32 %v2777_v34, %v3396_v50  ;;  %v1635_v46 = vmul.f32 %v2777_v34, %v3394_v49 }
 0x372   : > { %v1587_v35 = vpop.xlane.xlu0 %1586  ;;  %1840 = vmatmul.mubr.bf16.vlgmr.msra.gmra.mxu1 %v1663_v39 }
 0x373   : > { %2784 = vrcp.f32 %v1587_v35 }
 0x374   : > { %v2779_v42 = vpop.eup %2778 }
 0x375   : > { %v1638_v41 = vmul.f32 %v2779_v42, %v3404_v28  ;;  %v1637_v59 = vmul.f32 %v2779_v42, %v3402_v54 }
 0x376   : > { %v1590_v60 = vpop.xlane.xlu1 %1589 }
 0x377   : > { %2786 = vrcp.f32 %v1590_v60  ;;  %v1666_v10 = vpack.c.bf16 %v1638_v41, %v1636_v45  ;;  %v1665_v61 = vpack.c.bf16 %v1637_v59, %v1635_v46 }
 0x378   : > { %v2781_v38 = vpop.eup %2780 }
 0x379   : > { %1847 = vmatprep.mubr.bf16.mxu1 %v1666_v10  ;;  %v1640_v40 = vmul.f32 %v2781_v38, %v3412_v36  ;;  %v1639_v28 = vmul.f32 %v2781_v38, %v3410_v32 }
 0x37a   : > { %v1593_v51 = vpop.xlane.xlu0 %1592  ;;  %1848 = vmatmul.mubr.bf16.gmra.mxu1 %v1665_v61 }
 0x37b   : > { %2788 = vrcp.f32 %v1593_v51 }
 0x37c   : > { %v2783_v56 = vpop.eup %2782 }
 0x37d   : > { %v1642_v50 = vmul.f32 %v2783_v56, %v3420_v48  ;;  %v1641_v49 = vmul.f32 %v2783_v56, %v3418_v37 }
 0x37e   : > { %v1596_v62 = vpop.xlane.xlu1 %1595 }
 0x37f   : > { %2790 = vrcp.f32 %v1596_v62  ;;  %v1668_v54 = vpack.c.bf16 %v1642_v50, %v1640_v40  ;;  %v1667_v1 = vpack.c.bf16 %v1641_v49, %v1639_v28 }
 0x380   : > { %v2785_v63 = vpop.eup %2784 }
 0x381   : > { %1855 = vmatprep.mubr.bf16.mxu1 %v1668_v54  ;;  %v1644_v13 = vmul.f32 %v2785_v63, %v3428_v44  ;;  %v1643_v48 = vmul.f32 %v2785_v63, %v3426_v4 }
 0x382   : > { %v1599_v0 = vpop.xlane.xlu0 %1598  ;;  %1856 = vmatmul.mubr.bf16.gmra.mxu1 %v1667_v1 }
 0x383   : > { %2792 = vrcp.f32 %v1599_v0 }
 0x384   : > { %v2787_v17 = vpop.eup %2786 }
 0x385   : > { %v1646_v36 = vmul.f32 %v2787_v17, %v3436_v22  ;;  %v1645_v32 = vmul.f32 %v2787_v17, %v3434_v20 }
 0x386   : > { %v1602_v2 = vpop.xlane.xlu1 %1601 }
 0x387   : > { %2794 = vrcp.f32 %v1602_v2  ;;  %v1670_v37 = vpack.c.bf16 %v1646_v36, %v1644_v13  ;;  %v1669_v23 = vpack.c.bf16 %v1645_v32, %v1643_v48 }
 0x388   : > { %v2789_v24 = vpop.eup %2788 }
 0x389   : > { %1863 = vmatprep.mubr.bf16.mxu1 %v1670_v37  ;;  %v1648_v27 = vmul.f32 %v2789_v24, %v3444_v53  ;;  %v1647_v22 = vmul.f32 %v2789_v24, %v3442_v55 }
 0x38a   : > { %v1605_v25 = vpop.xlane.xlu0 %1604  ;;  %1864 = vmatmul.mubr.bf16.gmra.mxu1 %v1669_v23 }
 0x38b   : > { %2796 = vrcp.f32 %v1605_v25 }
 0x38c   : > { %v2791_v26 = vpop.eup %2790 }
 0x38d   : > { %v1650_v44 = vmul.f32 %v2791_v26, %v3452_v33  ;;  %v1649_v4 = vmul.f32 %v2791_v26, %v3450_v58 }
 0x38e   : > { %v1608_v5 = vpop.xlane.xlu1 %1607 }
 0x38f   : > { %2798 = vrcp.f32 %v1608_v5  ;;  %v1672_v20 = vpack.c.bf16 %v1650_v44, %v1648_v27  ;;  %v1671_v6 = vpack.c.bf16 %v1649_v4, %v1647_v22 }
 0x390   : > { %v2793_v52 = vpop.eup %2792 }
 0x391   : > { %1871 = vmatprep.mubr.bf16.mxu1 %v1672_v20  ;;  %v1652_v31 = vmul.f32 %v2793_v52, %v3460_v12  ;;  %v1651_v33 = vmul.f32 %v2793_v52, %v3458_v11 }
 0x392   : > { %v1611_v29 = vpop.xlane.xlu0 %1610  ;;  %1872 = vmatmul.mubr.bf16.gmra.mxu1 %v1671_v6 }
 0x393   : > { %2800 = vrcp.f32 %v1611_v29 }
 0x394   : > { %v2795_v30 = vpop.eup %2794 }
 0x395   : > { %v1654_v53 = vmul.f32 %v2795_v30, %v3468_v15  ;;  %v1653_v55 = vmul.f32 %v2795_v30, %v3466_v14 }
 0x396   : > { %v1614_v57 = vpop.xlane.xlu1 %1613 }
 0x397   : > { %2802 = vrcp.f32 %v1614_v57  ;;  %v1674_v58 = vpack.c.bf16 %v1654_v53, %v1652_v31  ;;  %v1673_v8 = vpack.c.bf16 %v1653_v55, %v1651_v33 }
 0x398   : > { %v2797_v9 = vpop.eup %2796 }
 0x399   : > { %1879 = vmatprep.mubr.bf16.mxu1 %v1674_v58  ;;  %v1656_v34 = vmul.f32 %v2797_v9, %v3474_v7  ;;  %v1655_v12 = vmul.f32 %v2797_v9, %v3472_v43  ;;  %v2706_v43 = vld [vmem:[%s3635_s5] sm:$0xff]  }
 0x39a   : > { %1880 = vmatmul.mubr.bf16.gmra.mxu1 %v1673_v8  ;;  %1928 = vxpose.xlu0.c.b16.start [1/2] (short) (narrow) %v2706_v43, 16 }
 0x39c   : > { %v2799_v39 = vpop.eup %2798 }
 0x39d   : > { %v1658_v35 = vmul.f32 %v2799_v39, %v3480_v47  ;;  %v1657_v15 = vmul.f32 %v2799_v39, %v3478_v18  ;;  %v2707_v18 = vld [vmem:[%s3635_s5 + $0x8] sm:$0xff]  }
 0x39e   : > { %1929 = vxpose.xlu0.c.b16.end [2/2] (short) (narrow) %v2707_v18, 16 }
 0x39f   : > { %v1676_v42 = vpack.c.bf16 %v1658_v35, %v1656_v34  ;;  %v1675_v11 = vpack.c.bf16 %v1657_v15, %v1655_v12 }
 0x3a0   : > { %v2801_v14 = vpop.eup %2800 }
 0x3a1   : > { %1887 = vmatprep.mubr.bf16.mxu1 %v1676_v42  ;;  %v1660_v41 = vmul.f32 %v2801_v14, %v3486_v19  ;;  %v1659_v59 = vmul.f32 %v2801_v14, %v3484_v16  ;;  %v2898_v19 = vmov 0.0  }
 0x3a2   : > { %1888 = vmatmul.mubr.bf16.gmra.mxu1 %v1675_v11  ;;  %2570 = vmatprep.subr.bf16.mxu1 %v2898_v19 }
 0x3a4   : > { %v2803_v45 = vpop.eup %2802 }
 0x3a5   : > { %v1662_v46 = vmul.f32 %v2803_v45, %v3492_v21  ;;  %v1661_v7 = vmul.f32 %v2803_v45, %v3490_v3 }
 0x3a7   : > { %v1678_v60 = vpack.c.bf16 %v1662_v46, %v1660_v41  ;;  %v1677_v47 = vpack.c.bf16 %v1661_v7, %v1659_v59 }
 0x3a9   : > { %1895 = vmatprep.mubr.bf16.mxu1 %v1678_v60 }
 0x3aa   : > { %1896 = vmatmul.mubr.bf16.gmra.mxu1 %v1677_v47 }
 0x3ab   : > { %2586 = vmatprep.mubr.msk.bf16.mxu1 %vm2899_vm4, %v2898_v19 }
 0x432   : > { %v2445_v16 = vpop.f32.mrf.mxu1 }
 0x434   : > { %v2446_v3 = vpop.f32.mrf.mxu1 }
 0x435   : > { %v3536_v21 = vadd.f32 %v2446_v3, %v2445_v16  ;;  %v1936_v3 = vpop.trf.xlu0 }
 0x436   : > { %v2448_v10 = vpop.f32.mrf.mxu1 }
 0x438   : > { %v2449_v61 = vpop.f32.mrf.mxu1 }
 0x439   : > { %v3538_v38 = vadd.f32 %v2449_v61, %v2448_v10 }
 0x43a   : > { %v2451_v51 = vpop.f32.mrf.mxu1 }
 0x43b   : > { %v1908_v56 = vpack.c.bf16 %v3538_v38, %v3536_v21 }
 0x43c   : > { %v2452_v40 = vpop.f32.mrf.mxu1 }
 0x43d   : > { %v3542_v50 = vadd.f32 %v2452_v40, %v2451_v51  ;;  %v1948_v16 = vsel %vm1237_vm3, %v1908_v56, 0 }
 0x43e   : > { %v2454_v28 = vpop.f32.mrf.mxu1 }
 0x440   : > { %v2455_v49 = vpop.f32.mrf.mxu1 }
 0x441   : > { %v3544_v62 = vadd.f32 %v2455_v49, %v2454_v28 }
 0x442   : > { %v2457_v54 = vpop.f32.mrf.mxu1 }
 0x443   : > { %v1909_v1 = vpack.c.bf16 %v3544_v62, %v3542_v50 }
 0x444   : > { %v2458_v63 = vpop.f32.mrf.mxu1 }
 0x445   : > { %v2459_v0 = vadd.f32 %v2458_v63, %v2457_v54  ;;  %v1951_v18 = vsel %vm1237_vm3, %v1909_v1, 0 }
 0x446   : > { %v2460_v17 = vpop.f32.mrf.mxu1 }
 0x448   : > { %v2461_v13 = vpop.f32.mrf.mxu1 }
 0x449   : > { %v2462_v36 = vadd.f32 %v2461_v13, %v2460_v17 }
 0x44a   : > { %v2463_v48 = vpop.f32.mrf.mxu1 }
 0x44b   : > { %v1910_v32 = vpack.c.bf16 %v2462_v36, %v2459_v0 }
 0x44c   : > { %v2464_v2 = vpop.f32.mrf.mxu1 }
 0x44d   : > { %v2465_v37 = vadd.f32 %v2464_v2, %v2463_v48  ;;  %v1954_v43 = vsel %vm1237_vm3, %v1910_v32, 0 }
 0x44e   : > { %v2466_v23 = vpop.f32.mrf.mxu1 }
 0x450   : > { %v2467_v24 = vpop.f32.mrf.mxu1 }
 0x451   : > { %v2468_v25 = vadd.f32 %v2467_v24, %v2466_v23 }
 0x452   : > { %v2469_v26 = vpop.f32.mrf.mxu1 }
 0x453   : > { %v1911_v27 = vpack.c.bf16 %v2468_v25, %v2465_v37 }
 0x454   : > { %v2470_v44 = vpop.f32.mrf.mxu1 }
 0x455   : > { %v2471_v59 = vadd.f32 %v2470_v44, %v2469_v26  ;;  %v1957_v47 = vsel %vm1237_vm3, %v1911_v27, 0 }
 0x456   : > { %v2472_v22 = vpop.f32.mrf.mxu1 }
 0x458   : > { %v2473_v4 = vpop.f32.mrf.mxu1 }
 0x459   : > { %v2474_v41 = vadd.f32 %v2473_v4, %v2472_v22 }
 0x45a   : > { %v2475_v5 = vpop.f32.mrf.mxu1 }
 0x45b   : > { %v1912_v7 = vpack.c.bf16 %v2474_v41, %v2471_v59 }
 0x45c   : > { %v2476_v20 = vpop.f32.mrf.mxu1 }
 0x45d   : > { %v2477_v14 = vadd.f32 %v2476_v20, %v2475_v5  ;;  %v1960_v60 = vsel %vm1237_vm3, %v1912_v7, 0 }
 0x45e   : > { %v2478_v6 = vpop.f32.mrf.mxu1 }
 0x460   : > { %v2479_v52 = vpop.f32.mrf.mxu1 }
 0x461   : > { %v2480_v42 = vadd.f32 %v2479_v52, %v2478_v6 }
 0x462   : > { %v2481_v29 = vpop.f32.mrf.mxu1 }
 0x463   : > { %v1913_v45 = vpack.c.bf16 %v2480_v42, %v2477_v14 }
 0x464   : > { %v2482_v30 = vpop.f32.mrf.mxu1 }
 0x465   : > { %v2483_v12 = vadd.f32 %v2482_v30, %v2481_v29  ;;  %v1963_v46 = vsel %vm1237_vm3, %v1913_v45, 0 }
 0x466   : > { %v2484_v31 = vpop.f32.mrf.mxu1 }
 0x468   : > { %v2485_v53 = vpop.f32.mrf.mxu1 }
 0x469   : > { %v2486_v34 = vadd.f32 %v2485_v53, %v2484_v31 }
 0x46a   : > { %v2487_v33 = vpop.f32.mrf.mxu1 }
 0x46b   : > { %v1914_v15 = vpack.c.bf16 %v2486_v34, %v2483_v12 }
 0x46c   : > { %v2488_v55 = vpop.f32.mrf.mxu1 }
 0x46d   : > { %v2489_v8 = vadd.f32 %v2488_v55, %v2487_v33  ;;  %v1966_v11 = vsel %vm1237_vm3, %v1914_v15, 0 }
 0x46e   : > { %v2490_v57 = vpop.f32.mrf.mxu1 }
 0x470   : > { %v2491_v58 = vpop.f32.mrf.mxu1 }
 0x471   : > { %v2492_v9 = vadd.f32 %v2491_v58, %v2490_v57 }
 0x473   : > { %v1915_v39 = vpack.c.bf16 %v2492_v9, %v2489_v8 }
 0x475   : > { %v1969_v35 = vsel %vm1237_vm3, %v1915_v39, 0 }
 0x476   : > { %2571 = vmatpush3.bf16.xpose.msra.mxu1 %v1969_v35 }
 0x477   : > { %2572 = vmatprep.subr.bf16.mxu1 %v2898_v19 }
 0x47e   : > { %2573 = vmatpush3.bf16.xpose.msra.mxu1 %v1966_v11 }
 0x47f   : > { %2574 = vmatprep.subr.bf16.mxu1 %v2898_v19 }
 0x486   : > { %2575 = vmatpush3.bf16.xpose.msra.mxu1 %v1963_v46 }
 0x487   : > { %2576 = vmatprep.subr.bf16.mxu1 %v2898_v19 }
 0x48e   : > { %2577 = vmatpush3.bf16.xpose.msra.mxu1 %v1960_v60 }
 0x48f   : > { %2578 = vmatprep.subr.bf16.mxu1 %v2898_v19 }
 0x496   : > { %2579 = vmatpush3.bf16.xpose.msra.mxu1 %v1957_v47 }
 0x497   : > { %2580 = vmatprep.subr.bf16.mxu1 %v2898_v19 }
 0x49e   : > { %2581 = vmatpush3.bf16.xpose.msra.mxu1 %v1954_v43 }
 0x49f   : > { %2582 = vmatprep.subr.bf16.mxu1 %v2898_v19 }
 0x4a6   : > { %2583 = vmatpush3.bf16.xpose.msra.mxu1 %v1951_v18 }
 0x4a7   : > { %2584 = vmatprep.subr.bf16.mxu1 %v2898_v19 }
 0x4ae   : > { %2585 = vmatpush3.bf16.xpose.msra.mxu1 %v1948_v16 }
 0x4b5   : > { %2587 = vmatmul.mubr.msk.bf16.vlgmr.msra.gmra.mxu1 %vm1237_vm3, %v1936_v3 }
 0x575   : > { %v2005_v19 = vpop.f32.mrf.mxu1 }
 0x576   : > { %2011 = vst [vmem:[%s258_s9] sm:$0xf] %v2005_v19 }
 0x577   : > { %v2588_v21 = vpop.f32.mrf.mxu1 }
 0x578   : > { %2817 = shalt.err (!%p2814_p7)
}
 0x579   : > { %s2818_s17 = scalar_lea.hbm %s3574_s29, 64  ;;  %s2822_s14 = scalar_lea.hbm %s3636_s6, 256 }
 0x57a   : > { %p2819_p9 = scmp.ne.s32.totalorder %s3574_s29, %s2818_s17  ;;  %p2823_p12 = scmp.lt.s32.totalorder %s3574_s29, %s3636_s6 }
 0x57b   : > { %p2824_p13 = scmp.lt.s32.totalorder %s2822_s14, %s2818_s17 }
 0x57c   : > { %p2820_p10 = pnand %p2819_p9, %p2987_p3 }
 0x57d   : > { %p2825_p0 = por %p2824_p13, %p2823_p12 }
 0x57e   : > { %p2821_p11 = pneg %p2820_p10 }
 0x580   : > { %p2826_p1 = pnand %p2825_p0, %p2821_p11 }
 0x582   : > { %2829 = shalt.err (!%p2826_p1)
}
 0x583   : > { %2600 = dma.vmem_to_hbm [thread:$0]  (%p2987_p3), %s3576_s18, 64, %s3574_s29, %s2013_s25   ;;  %v2008_v10 = vpop.f32.mrf.mxu1 }
 0x585   : > { %v2589_v61 = vpop.f32.mrf.mxu1 }
 0x586 PF: > { %p2606_p2 = scmp.ge.s32.totalorder %s2896_s28, 2  ;;  %s2040_s24 = sand.u32 1, %s2868_s21  }
 0x587   : > { %s2041_s12 = scalar_lea.sflag [#allocation5], %s2040_s24 }
 0x588   : > { %p2603_p4 = pnand %p2606_p2, %p2996_p8 }
 0x58a   : > { %p2604_p5 = pneg %p2603_p4 }
 0x58c   : > { %2863 = dma.done.wait (%p2604_p5), %s2041_s12, 64  }
 0x58d   : > { %2865 = vsyncadd (%p2604_p5), %s2041_s12, 4294967232  ;;  %s19_s28 = sadd.s32 1, %s2896_s28   ;;  %s3639_s21 = smov %s2872_s22 }
 0x58e   : > { %p16_p6 = scmp.ge.s32.totalorder %s19_s28, 6   ;;  %s3640_s22 = smov %s2876_s23 }
 0x58f   : > { %s3641_s23 = smov %s3005_s15  ;;  %s3642_s24 = smov %s2888_s26 }
 0x590   : > { %s3643_s25 = smov %s2892_s27  ;;  %s3644_s26 = smov %s3647_s7 }
 0x591   : > { %s3645_s27 = smov %s3651_s8  ;;  %18 = sbr.rel (!%p16_p6) target bundleno = 5 (0x5), region = 84 }
 0x596   :  { %2046 = vsyncpa [#allocation5], 1 }
 0x597   :  { %2048 = vsyncpa [#allocation5 + $0x1], 1 }

</bundles_post_ra>
